<compile_context>
chip_gen: v7x
topology: tpu7x:2x2x1
jax: 0.10.0
libtpu: 0.0.40
codegen_flags: <defaults>
</compile_context>

<pallas_src>
import math
import jax
import jax.numpy as jnp
from jax.experimental import pallas as pl
from jax.experimental.pallas import tpu as pltpu

HIDDEN = 128


def _round_up(x, m):
    return ((x + m - 1) // m) * m


def gcn_forward_kernel(a_ref, x_ref, wx_ref,
                       wh2_ref, wh3_ref, wh4_ref, wh5_ref, wh6_ref,
                       b1_ref, b2_ref, b3_ref, b4_ref, b5_ref, b6_ref,
                       out_ref):
    f32 = jnp.float32
    bf16 = jnp.bfloat16
    H = HIDDEN

    a = a_ref[...]                                  # [Np, Np] bf16 normalized adjacency

    # One wide MXU pass for every x_in-side matmul:
    #   x_in @ [w1 | w2i | w3i | w4i | w5i | w6i_pad]  -> [Np, 6*H] f32
    xw = jnp.dot(x_ref[...], wx_ref[...], preferred_element_type=f32)

    # conv1: relu(A @ (x_in @ W1) + b1)
    h = jnp.dot(a, xw[:, 0:H].astype(bf16), preferred_element_type=f32) + b1_ref[...]
    h = jnp.maximum(h, 0.0)

    # conv2..conv4 on cat(x_in, h) with split weights:
    #   cat(x_in, h) @ W == x_in @ W[:F] (precomputed in xw) + h @ W[F:]
    for k, (wh_ref, b_ref) in enumerate(((wh2_ref, b2_ref),
                                         (wh3_ref, b3_ref),
                                         (wh4_ref, b4_ref)), start=1):
        t = xw[:, k * H:(k + 1) * H] + jnp.dot(h.astype(bf16), wh_ref[...],
                                               preferred_element_type=f32)
        h = jnp.maximum(jnp.dot(a, t.astype(bf16), preferred_element_type=f32)
                        + b_ref[...], 0.0)

    # lin1 on cat(x_in, h) -> relu
    h5 = jnp.maximum(xw[:, 4 * H:5 * H]
                     + jnp.dot(h.astype(bf16), wh5_ref[...], preferred_element_type=f32)
                     + b5_ref[...], 0.0)

    # lin2 on cat(x_in, h5); lane-dense (128 columns, only column 0 is the real logit)
    logits = (xw[:, 5 * H:6 * H]
              + jnp.dot(h5.astype(bf16), wh6_ref[...], preferred_element_type=f32)
              + b6_ref[...])
    out_ref[...] = jax.nn.sigmoid(logits)


def build_norm_adj(edge_list, num_nodes):
    """Dense D^-1/2 (A + I) D^-1/2 with PyG GCNConv conventions.

    edge_list: [E, 2] int array of (source, target) pairs; aggregation happens
    at the target node.
    """
    src = edge_list[:, 0]
    dst = edge_list[:, 1]
    adj = jnp.zeros((num_nodes, num_nodes), jnp.float32)
    adj = adj.at[dst, src].set(1.0)                     # A_hat[target, source] = 1
    adj = adj + jnp.eye(num_nodes, dtype=jnp.float32)   # self-loops
    deg = adj.sum(axis=1)
    dinv = jnp.where(deg > 0, 1.0 / jnp.sqrt(deg), 0.0)
    return dinv[:, None] * adj * dinv[None, :]


def init_params(key, node_features, hidden=HIDDEN):
    def glorot(k, shape):
        lim = math.sqrt(6.0 / (shape[0] + shape[1]))
        return jax.random.uniform(k, shape, jnp.float32, -lim, lim)

    ks = jax.random.split(key, 12)
    f, h = node_features, hidden
    return {
        "w1": glorot(ks[0], (f, h)),      "b1": 0.01 * glorot(ks[1], (1, h)),
        "w2": glorot(ks[2], (f + h, h)),  "b2": 0.01 * glorot(ks[3], (1, h)),
        "w3": glorot(ks[4], (f + h, h)),  "b3": 0.01 * glorot(ks[5], (1, h)),
        "w4": glorot(ks[6], (f + h, h)),  "b4": 0.01 * glorot(ks[7], (1, h)),
        "w5": glorot(ks[8], (f + h, h)),  "b5": 0.01 * glorot(ks[9], (1, h)),
        "w6": glorot(ks[10], (f + h, 1)), "b6": 0.01 * glorot(ks[11], (1, 1)),
    }


def _vmem_limit_bytes(n_pad, f_pad, hidden, wx_cols):
    inputs = (n_pad * n_pad * 2 + n_pad * f_pad * 2 + f_pad * wx_cols * 2
              + 5 * hidden * hidden * 2 + 6 * hidden * 4)
    activations = n_pad * wx_cols * 4 + 4 * n_pad * hidden * 4
    out = n_pad * hidden * 4
    need = inputs + activations + out
    return int(min(112 * (1 << 20), 2 * need + (8 << 20)))


def gcn_forward(x, edge_list, params):
    N, F = x.shape
    H = HIDDEN
    Np = _round_up(N, 128)   # lane- and sublane-aligned (A_hat is [Np, Np])
    Fp = _round_up(F, 128)

    bf16 = jnp.bfloat16

    # Padded, bf16 MXU operands (zero padding is exact: padded rows/cols never
    # influence real rows; padded output rows are sliced off below).
    a_hat = build_norm_adj(edge_list, N)
    a_pad = jnp.pad(a_hat, ((0, Np - N), (0, Np - N))).astype(bf16)
    x_pad = jnp.pad(x, ((0, Np - N), (0, Fp - F))).astype(bf16)

    def split(w):                       # cat(x_in, h) weight -> (x_in half, h half)
        return w[:F], w[F:]

    def pad_k(w):                       # pad contraction dim F -> Fp with zero rows
        return jnp.pad(w, ((0, Fp - F), (0, 0)))

    def pad_cols(w, cols):              # lane-dense output padding
        return jnp.pad(w, ((0, 0), (0, cols - w.shape[1])))

    w2i, w2h = split(params["w2"])
    w3i, w3h = split(params["w3"])
    w4i, w4h = split(params["w4"])
    w5i, w5h = split(params["w5"])
    w6i, w6h = split(params["w6"])

    # Fused x_in-side weight block: [Fp, 6*H]
    wx = jnp.concatenate(
        [pad_k(params["w1"]), pad_k(w2i), pad_k(w3i), pad_k(w4i), pad_k(w5i),
         pad_k(pad_cols(w6i, H))], axis=1).astype(bf16)
    wh6 = pad_cols(w6h, H).astype(bf16)
    b6 = pad_cols(params["b6"], H)

    args = (a_pad, x_pad, wx,
            w2h.astype(bf16), w3h.astype(bf16), w4h.astype(bf16),
            w5h.astype(bf16), wh6,
            params["b1"], params["b2"], params["b3"],
            params["b4"], params["b5"], b6)

    vmem_spec = pl.BlockSpec(memory_space=pltpu.MemorySpace.VMEM)
    out = pl.pallas_call(
        gcn_forward_kernel,
        out_shape=jax.ShapeDtypeStruct((Np, H), jnp.float32),
        in_specs=[vmem_spec] * len(args),     # whole arrays, single-buffered VMEM
        out_specs=vmem_spec,
        compiler_params=pltpu.CompilerParams(
            vmem_limit_bytes=_vmem_limit_bytes(Np, Fp, H, 6 * H)),
    )(*args)

    # num_classes == 1 branch: torch.flatten(torch.sigmoid(x)); real logit is column 0.
    return out[:N, 0]


def gcn_forward_ref(x, edge_list, params):
    """Pure-JAX f32 reference (mirrors the PyTorch forward with explicit concats)."""
    a_hat = build_norm_adj(edge_list, x.shape[0])
    x_in = x

    def gcnconv(h, w, b):
        return a_hat @ (h @ w) + b

    h = jax.nn.relu(gcnconv(x_in, params["w1"], params["b1"]))
    h = jax.nn.relu(gcnconv(jnp.concatenate([x_in, h], -1), params["w2"], params["b2"]))
    h = jax.nn.relu(gcnconv(jnp.concatenate([x_in, h], -1), params["w3"], params["b3"]))
    h = jax.nn.relu(gcnconv(jnp.concatenate([x_in, h], -1), params["w4"], params["b4"]))
    h = jax.nn.relu(jnp.concatenate([x_in, h], -1) @ params["w5"] + params["b5"])
    logits = jnp.concatenate([x_in, h], -1) @ params["w6"] + params["b6"]
    return jax.nn.sigmoid(logits).reshape(-1)


if __name__ == "__main__":
    N_NODES = 8
    NODE_FEATURES = 16
    NUM_CLASSES = 2  # -> single sigmoid output per node, flattened

    key = jax.random.PRNGKey(0)
    k_x, k_p = jax.random.split(key)

    # Deterministic inputs: node features + a bidirectional ring graph.
    x = jax.random.normal(k_x, (N_NODES, NODE_FEATURES), jnp.float32)
    fwd = [(i, (i + 1) % N_NODES) for i in range(N_NODES)]
    bwd = [((i + 1) % N_NODES, i) for i in range(N_NODES)]
    edge_list = jnp.array(fwd + bwd, dtype=jnp.int32)  # [E, 2]

    params = init_params(k_p, NODE_FEATURES)

    out = gcn_forward(x, edge_list, params)
    out = jax.block_until_ready(out)

    ref = gcn_forward_ref(x, edge_list, params)
    assert out.shape == (N_NODES,)
    # bf16 MXU operands (f32 accumulation) -> loosened tolerance vs the f32 reference.
    assert jnp.allclose(out, ref, atol=2e-2, rtol=2e-2), (out, ref)

    print("KERNEL_OK")
</pallas_src>

<mosaic_0001>
module attributes {stable_mosaic.version = 11 : i64} {
  func.func @gcn_forward_kernel(%arg0: memref<128x128xbf16, #tpu.memory_space<vmem>>, %arg1: memref<128x128xbf16, #tpu.memory_space<vmem>>, %arg2: memref<128x768xbf16, #tpu.memory_space<vmem>>, %arg3: memref<128x128xbf16, #tpu.memory_space<vmem>>, %arg4: memref<128x128xbf16, #tpu.memory_space<vmem>>, %arg5: memref<128x128xbf16, #tpu.memory_space<vmem>>, %arg6: memref<128x128xbf16, #tpu.memory_space<vmem>>, %arg7: memref<128x128xbf16, #tpu.memory_space<vmem>>, %arg8: memref<1x128xf32, #tpu.memory_space<vmem>>, %arg9: memref<1x128xf32, #tpu.memory_space<vmem>>, %arg10: memref<1x128xf32, #tpu.memory_space<vmem>>, %arg11: memref<1x128xf32, #tpu.memory_space<vmem>>, %arg12: memref<1x128xf32, #tpu.memory_space<vmem>>, %arg13: memref<1x128xf32, #tpu.memory_space<vmem>>, %arg14: memref<128x128xf32, #tpu.memory_space<vmem>>) attributes {dimension_semantics = [], scalar_prefetch = 0 : i64, scratch_operands = 0 : i64, tpu.core_type = #tpu.core_type<tc>} {
    %c0 = arith.constant 0 : index
    %c0_0 = arith.constant 0 : index
    %0 = vector.load %arg0[%c0, %c0_0] : memref<128x128xbf16, #tpu.memory_space<vmem>>, vector<128x128xbf16>
    %c0_1 = arith.constant 0 : index
    %c0_2 = arith.constant 0 : index
    %1 = vector.load %arg1[%c0_1, %c0_2] : memref<128x128xbf16, #tpu.memory_space<vmem>>, vector<128x128xbf16>
    %c0_3 = arith.constant 0 : index
    %c0_4 = arith.constant 0 : index
    %2 = vector.load %arg2[%c0_3, %c0_4] : memref<128x768xbf16, #tpu.memory_space<vmem>>, vector<128x768xbf16>
    %cst = arith.constant dense<0.000000e+00> : vector<128x768xf32>
    %3 = tpu.matmul %1, %2, %cst {dimension_numbers = #tpu.dot_dimension_numbers<[1], [0], [0], [1], [0, 0, 1, 1], [], []>} : vector<128x128xbf16>, vector<128x768xbf16>, vector<128x768xf32> -> vector<128x768xf32>
    %4 = vector.extract_strided_slice %3 {offsets = [0, 0], sizes = [128, 128], strides = [1, 1]} : vector<128x768xf32> to vector<128x128xf32>
    %5 = arith.truncf %4 : vector<128x128xf32> to vector<128x128xbf16>
    %cst_5 = arith.constant dense<0.000000e+00> : vector<128x128xf32>
    %6 = tpu.matmul %0, %5, %cst_5 {dimension_numbers = #tpu.dot_dimension_numbers<[1], [0], [0], [1], [0, 0, 1, 1], [], []>} : vector<128x128xbf16>, vector<128x128xbf16>, vector<128x128xf32> -> vector<128x128xf32>
    %c0_6 = arith.constant 0 : index
    %c0_7 = arith.constant 0 : index
    %7 = vector.load %arg8[%c0_6, %c0_7] : memref<1x128xf32, #tpu.memory_space<vmem>>, vector<1x128xf32>
    %8 = vector.broadcast %7 : vector<1x128xf32> to vector<128x128xf32>
    %9 = arith.addf %6, %8 : vector<128x128xf32>
    %cst_8 = arith.constant 0.000000e+00 : f32
    %10 = vector.broadcast %cst_8 : f32 to vector<128x128xf32>
    %11 = arith.maximumf %9, %10 : vector<128x128xf32>
    %12 = vector.extract_strided_slice %3 {offsets = [0, 128], sizes = [128, 128], strides = [1, 1]} : vector<128x768xf32> to vector<128x128xf32>
    %13 = arith.truncf %11 : vector<128x128xf32> to vector<128x128xbf16>
    %c0_9 = arith.constant 0 : index
    %c0_10 = arith.constant 0 : index
    %14 = vector.load %arg3[%c0_9, %c0_10] : memref<128x128xbf16, #tpu.memory_space<vmem>>, vector<128x128xbf16>
    %cst_11 = arith.constant dense<0.000000e+00> : vector<128x128xf32>
    %15 = tpu.matmul %13, %14, %cst_11 {dimension_numbers = #tpu.dot_dimension_numbers<[1], [0], [0], [1], [0, 0, 1, 1], [], []>} : vector<128x128xbf16>, vector<128x128xbf16>, vector<128x128xf32> -> vector<128x128xf32>
    %16 = arith.addf %12, %15 : vector<128x128xf32>
    %17 = arith.truncf %16 : vector<128x128xf32> to vector<128x128xbf16>
    %cst_12 = arith.constant dense<0.000000e+00> : vector<128x128xf32>
    %18 = tpu.matmul %0, %17, %cst_12 {dimension_numbers = #tpu.dot_dimension_numbers<[1], [0], [0], [1], [0, 0, 1, 1], [], []>} : vector<128x128xbf16>, vector<128x128xbf16>, vector<128x128xf32> -> vector<128x128xf32>
    %c0_13 = arith.constant 0 : index
    %c0_14 = arith.constant 0 : index
    %19 = vector.load %arg9[%c0_13, %c0_14] : memref<1x128xf32, #tpu.memory_space<vmem>>, vector<1x128xf32>
    %20 = vector.broadcast %19 : vector<1x128xf32> to vector<128x128xf32>
    %21 = arith.addf %18, %20 : vector<128x128xf32>
    %cst_15 = arith.constant 0.000000e+00 : f32
    %22 = vector.broadcast %cst_15 : f32 to vector<128x128xf32>
    %23 = arith.maximumf %21, %22 : vector<128x128xf32>
    %24 = vector.extract_strided_slice %3 {offsets = [0, 256], sizes = [128, 128], strides = [1, 1]} : vector<128x768xf32> to vector<128x128xf32>
    %25 = arith.truncf %23 : vector<128x128xf32> to vector<128x128xbf16>
    %c0_16 = arith.constant 0 : index
    %c0_17 = arith.constant 0 : index
    %26 = vector.load %arg4[%c0_16, %c0_17] : memref<128x128xbf16, #tpu.memory_space<vmem>>, vector<128x128xbf16>
    %cst_18 = arith.constant dense<0.000000e+00> : vector<128x128xf32>
    %27 = tpu.matmul %25, %26, %cst_18 {dimension_numbers = #tpu.dot_dimension_numbers<[1], [0], [0], [1], [0, 0, 1, 1], [], []>} : vector<128x128xbf16>, vector<128x128xbf16>, vector<128x128xf32> -> vector<128x128xf32>
    %28 = arith.addf %24, %27 : vector<128x128xf32>
    %29 = arith.truncf %28 : vector<128x128xf32> to vector<128x128xbf16>
    %cst_19 = arith.constant dense<0.000000e+00> : vector<128x128xf32>
    %30 = tpu.matmul %0, %29, %cst_19 {dimension_numbers = #tpu.dot_dimension_numbers<[1], [0], [0], [1], [0, 0, 1, 1], [], []>} : vector<128x128xbf16>, vector<128x128xbf16>, vector<128x128xf32> -> vector<128x128xf32>
    %c0_20 = arith.constant 0 : index
    %c0_21 = arith.constant 0 : index
    %31 = vector.load %arg10[%c0_20, %c0_21] : memref<1x128xf32, #tpu.memory_space<vmem>>, vector<1x128xf32>
    %32 = vector.broadcast %31 : vector<1x128xf32> to vector<128x128xf32>
    %33 = arith.addf %30, %32 : vector<128x128xf32>
    %cst_22 = arith.constant 0.000000e+00 : f32
    %34 = vector.broadcast %cst_22 : f32 to vector<128x128xf32>
    %35 = arith.maximumf %33, %34 : vector<128x128xf32>
    %36 = vector.extract_strided_slice %3 {offsets = [0, 384], sizes = [128, 128], strides = [1, 1]} : vector<128x768xf32> to vector<128x128xf32>
    %37 = arith.truncf %35 : vector<128x128xf32> to vector<128x128xbf16>
    %c0_23 = arith.constant 0 : index
    %c0_24 = arith.constant 0 : index
    %38 = vector.load %arg5[%c0_23, %c0_24] : memref<128x128xbf16, #tpu.memory_space<vmem>>, vector<128x128xbf16>
    %cst_25 = arith.constant dense<0.000000e+00> : vector<128x128xf32>
    %39 = tpu.matmul %37, %38, %cst_25 {dimension_numbers = #tpu.dot_dimension_numbers<[1], [0], [0], [1], [0, 0, 1, 1], [], []>} : vector<128x128xbf16>, vector<128x128xbf16>, vector<128x128xf32> -> vector<128x128xf32>
    %40 = arith.addf %36, %39 : vector<128x128xf32>
    %41 = arith.truncf %40 : vector<128x128xf32> to vector<128x128xbf16>
    %cst_26 = arith.constant dense<0.000000e+00> : vector<128x128xf32>
    %42 = tpu.matmul %0, %41, %cst_26 {dimension_numbers = #tpu.dot_dimension_numbers<[1], [0], [0], [1], [0, 0, 1, 1], [], []>} : vector<128x128xbf16>, vector<128x128xbf16>, vector<128x128xf32> -> vector<128x128xf32>
    %c0_27 = arith.constant 0 : index
    %c0_28 = arith.constant 0 : index
    %43 = vector.load %arg11[%c0_27, %c0_28] : memref<1x128xf32, #tpu.memory_space<vmem>>, vector<1x128xf32>
    %44 = vector.broadcast %43 : vector<1x128xf32> to vector<128x128xf32>
    %45 = arith.addf %42, %44 : vector<128x128xf32>
    %cst_29 = arith.constant 0.000000e+00 : f32
    %46 = vector.broadcast %cst_29 : f32 to vector<128x128xf32>
    %47 = arith.maximumf %45, %46 : vector<128x128xf32>
    %48 = vector.extract_strided_slice %3 {offsets = [0, 512], sizes = [128, 128], strides = [1, 1]} : vector<128x768xf32> to vector<128x128xf32>
    %49 = arith.truncf %47 : vector<128x128xf32> to vector<128x128xbf16>
    %c0_30 = arith.constant 0 : index
    %c0_31 = arith.constant 0 : index
    %50 = vector.load %arg6[%c0_30, %c0_31] : memref<128x128xbf16, #tpu.memory_space<vmem>>, vector<128x128xbf16>
    %cst_32 = arith.constant dense<0.000000e+00> : vector<128x128xf32>
    %51 = tpu.matmul %49, %50, %cst_32 {dimension_numbers = #tpu.dot_dimension_numbers<[1], [0], [0], [1], [0, 0, 1, 1], [], []>} : vector<128x128xbf16>, vector<128x128xbf16>, vector<128x128xf32> -> vector<128x128xf32>
    %52 = arith.addf %48, %51 : vector<128x128xf32>
    %c0_33 = arith.constant 0 : index
    %c0_34 = arith.constant 0 : index
    %53 = vector.load %arg12[%c0_33, %c0_34] : memref<1x128xf32, #tpu.memory_space<vmem>>, vector<1x128xf32>
    %54 = vector.broadcast %53 : vector<1x128xf32> to vector<128x128xf32>
    %55 = arith.addf %52, %54 : vector<128x128xf32>
    %cst_35 = arith.constant 0.000000e+00 : f32
    %56 = vector.broadcast %cst_35 : f32 to vector<128x128xf32>
    %57 = arith.maximumf %55, %56 : vector<128x128xf32>
    %58 = vector.extract_strided_slice %3 {offsets = [0, 640], sizes = [128, 128], strides = [1, 1]} : vector<128x768xf32> to vector<128x128xf32>
    %59 = arith.truncf %57 : vector<128x128xf32> to vector<128x128xbf16>
    %c0_36 = arith.constant 0 : index
    %c0_37 = arith.constant 0 : index
    %60 = vector.load %arg7[%c0_36, %c0_37] : memref<128x128xbf16, #tpu.memory_space<vmem>>, vector<128x128xbf16>
    %cst_38 = arith.constant dense<0.000000e+00> : vector<128x128xf32>
    %61 = tpu.matmul %59, %60, %cst_38 {dimension_numbers = #tpu.dot_dimension_numbers<[1], [0], [0], [1], [0, 0, 1, 1], [], []>} : vector<128x128xbf16>, vector<128x128xbf16>, vector<128x128xf32> -> vector<128x128xf32>
    %62 = arith.addf %58, %61 : vector<128x128xf32>
    %c0_39 = arith.constant 0 : index
    %c0_40 = arith.constant 0 : index
    %63 = vector.load %arg13[%c0_39, %c0_40] : memref<1x128xf32, #tpu.memory_space<vmem>>, vector<1x128xf32>
    %64 = vector.broadcast %63 : vector<1x128xf32> to vector<128x128xf32>
    %65 = arith.addf %62, %64 : vector<128x128xf32>
    %66 = arith.negf %65 : vector<128x128xf32>
    %67 = math.exp %66 : vector<128x128xf32>
    %cst_41 = arith.constant 1.000000e+00 : f32
    %68 = vector.broadcast %cst_41 : f32 to vector<128x128xf32>
    %69 = arith.addf %68, %67 : vector<128x128xf32>
    %70 = arith.divf %68, %69 : vector<128x128xf32>
    %c0_42 = arith.constant 0 : index
    %c0_43 = arith.constant 0 : index
    %71 = vector.load %arg14[%c0_42, %c0_43] : memref<128x128xf32, #tpu.memory_space<vmem>>, vector<128x128xf32>
    tpu.vector_store %arg14[%c0_42, %c0_43], %70 {strides = array<i32>} : memref<128x128xf32, #tpu.memory_space<vmem>>, vector<128x128xf32>,
    return
  }
}

</mosaic_0001>

<bundles_post_ra>
// kernel: tpu_custom_call.1
= control target key start
LH: loop header
LB: loop body
LE: loop exit
PB: predicated region body
PF: predicated region fallthrough
CT: control target
= control target key end

     0   :  { %19 = vsyncpa [#allocation3], 0  ;;  %s4201_s0 = inlined_call_operand.hbm [shape: bf16[128,128], index: 0, kind: input, shape index: {}]   ;;  %s4202_s1 = inlined_call_operand.hbm [shape: bf16[128,128], index: 1, kind: input, shape index: {}]   ;;  %s4203_s2 = inlined_call_operand.hbm [shape: bf16[128,768], index: 2, kind: input, shape index: {}]   ;;  %s4204_s3 = inlined_call_operand.hbm [shape: bf16[128,128], index: 3, kind: input, shape index: {}]   ;;  %s4205_s4 = inlined_call_operand.hbm [shape: bf16[128,128], index: 4, kind: input, shape index: {}]   ;;  %s4206_s5 = inlined_call_operand.hbm [shape: bf16[128,128], index: 5, kind: input, shape index: {}]   ;;  %s4207_s6 = inlined_call_operand.hbm [shape: bf16[128,128], index: 6, kind: input, shape index: {}]   ;;  %s4208_s7 = inlined_call_operand.hbm [shape: bf16[128,128], index: 7, kind: input, shape index: {}]   ;;  %s4209_s8 = inlined_call_operand.vmem [shape: f32[1,128], index: 8, kind: input, shape index: {}]   ;;  %s4210_s9 = inlined_call_operand.vmem [shape: f32[1,128], index: 9, kind: input, shape index: {}]   ;;  %s4211_s10 = inlined_call_operand.vmem [shape: f32[1,128], index: 10, kind: input, shape index: {}]   ;;  %s4212_s11 = inlined_call_operand.vmem [shape: f32[1,128], index: 11, kind: input, shape index: {}]   ;;  %s4213_s12 = inlined_call_operand.vmem [shape: f32[1,128], index: 12, kind: input, shape index: {}]   ;;  %s4214_s13 = inlined_call_operand.vmem [shape: f32[1,128], index: 13, kind: input, shape index: {}]   ;;  %s4215_s14 = inlined_call_operand.hbm [shape: f32[128,128], index: 14, kind: output, shape index: {}]  }
   0x1   :  { %20 = vsyncpa [#allocation6], 0 }
   0x2   :  { %21 = vsyncpa [#allocation9], 0 }
   0x3   :  { %22 = vsyncpa [#allocation12], 0 }
   0x4   :  { %23 = vsyncpa [#allocation15], 0 }
   0x5   :  { %24 = vsyncpa [#allocation4], 0  ;;  %s3544_s29 = smov [#allocation5]   ;;  %s3545_s15 = smov [#allocation8]  }
   0x6   :  { %s42_s30 = sshll.u32 %s3544_s29, 4  ;;  %s66_s16 = sshll.u32 %s3545_s15, 4  ;;  %s43_s30 = int_to_ptr.vmem [resolvable:$true] %s42_s30  ;;  %s3635_s16 = int_to_ptr.vmem [resolvable:$true] %s66_s16 }
   0x7   :  { %s3334_s19 = scalar_lea.hbm %s4202_s1, 1024 }
   0x8   :  { %p3335_p0 = scmp.ne.s32.totalorder %s4202_s1, %s3334_s19  ;;  %p3338_p1 = scmp.lt.u32.totalorder %s3334_s19, %s4202_s1 }
   0xa   :  { %p3340_p2 = pnand %p3338_p1, %p3335_p0 }
   0xc   :  { %3343 = shalt.err (!%p3340_p2)
}
   0xd   :  { %s3344_s24 = scalar_lea.vmem %s43_s30, 1024  ;;  %p3349_p4 = scmp.lt.s32.totalorder %s43_s30, %s43_s30 }
   0xe   :  { %p3345_p3 = scmp.ne.s32.totalorder %s43_s30, %s3344_s24  ;;  %p3350_p5 = scmp.lt.s32.totalorder %s3344_s24, %s3344_s24 }
  0x10   :  { %p3351_p6 = por %p3350_p5, %p3349_p4 }
  0x12   :  { %p3352_p7 = pnand %p3351_p6, %p3345_p3 }
  0x14   :  { %3355 = shalt.err (!%p3352_p7)
}
  0x15   :  { %s3546_s25 = smov 64   ;;  %s3547_s26 = smov 4  }
  0x16   :  { %48 = dma.hbm_to_vmem [thread:$0]  %s4202_s1, 1024, %s43_s30, [#allocation6], %s3546_s25, %s3546_s25, %s3547_s26  }
  0x17   :  { %s3356_s17 = scalar_lea.hbm %s4204_s3, 1024 }
  0x18   :  { %p3357_p8 = scmp.ne.s32.totalorder %s4204_s3, %s3356_s17  ;;  %p3360_p9 = scmp.lt.u32.totalorder %s3356_s17, %s4204_s3 }
  0x1a   :  { %p3362_p10 = pnand %p3360_p9, %p3357_p8 }
  0x1c   :  { %3365 = shalt.err (!%p3362_p10)
}
  0x1d   :  { %s3366_s22 = scalar_lea.vmem %s3635_s16, 1024  ;;  %p3371_p12 = scmp.lt.s32.totalorder %s3635_s16, %s3635_s16 }
  0x1e   :  { %p3367_p11 = scmp.ne.s32.totalorder %s3635_s16, %s3366_s22  ;;  %p3372_p13 = scmp.lt.s32.totalorder %s3366_s22, %s3366_s22 }
  0x20   :  { %p3373_p0 = por %p3372_p13, %p3371_p12 }
  0x22   :  { %p3374_p1 = pnand %p3373_p0, %p3367_p11 }
  0x24   :  { %3377 = shalt.err (!%p3374_p1)
}
  0x25   :  { %72 = dma.hbm_to_vmem [thread:$0]  %s4204_s3, 1024, %s3635_s16, [#allocation9], %s3546_s25, %s3546_s25, %s3547_s26  }
  0x26   :  { %s3548_s23 = smov [#allocation11]   ;;  %s3549_s27 = smov [#allocation2]  }
  0x27   :  { %s90_s24 = sshll.u32 %s3548_s23, 4  ;;  %s30_s28 = sshll.u32 %s3549_s27, 4  ;;  %s91_s24 = int_to_ptr.vmem [resolvable:$true] %s90_s24  ;;  %s3672_s28 = int_to_ptr.vmem [resolvable:$true] %s30_s28 }
  0x28   :  { %s3378_s17 = scalar_lea.hbm %s4206_s5, 1024 }
  0x29   :  { %p3379_p2 = scmp.ne.s32.totalorder %s4206_s5, %s3378_s17  ;;  %p3382_p3 = scmp.lt.u32.totalorder %s3378_s17, %s4206_s5 }
  0x2b   :  { %p3384_p4 = pnand %p3382_p3, %p3379_p2 }
  0x2d   :  { %3387 = shalt.err (!%p3384_p4)
}
  0x2e   :  { %s3388_s3 = scalar_lea.vmem %s91_s24, 1024  ;;  %p3393_p6 = scmp.lt.s32.totalorder %s91_s24, %s91_s24 }
  0x2f   :  { %p3389_p5 = scmp.ne.s32.totalorder %s91_s24, %s3388_s3  ;;  %p3394_p7 = scmp.lt.s32.totalorder %s3388_s3, %s3388_s3 }
  0x31   :  { %p3395_p8 = por %p3394_p7, %p3393_p6 }
  0x33   :  { %p3396_p9 = pnand %p3395_p8, %p3389_p5 }
  0x35   :  { %3399 = shalt.err (!%p3396_p9)
}
  0x36   :  { %96 = dma.hbm_to_vmem [thread:$0]  %s4206_s5, 1024, %s91_s24, [#allocation12], %s3546_s25, %s3546_s25, %s3547_s26  }
  0x37   :  { %s3400_s23 = scalar_lea.hbm %s4201_s0, 1024 }
  0x38   :  { %p3401_p10 = scmp.ne.s32.totalorder %s4201_s0, %s3400_s23  ;;  %p3404_p11 = scmp.lt.u32.totalorder %s3400_s23, %s4201_s0 }
  0x3a   :  { %p3406_p12 = pnand %p3404_p11, %p3401_p10 }
  0x3c   :  { %3409 = shalt.err (!%p3406_p12)
}
  0x3d   :  { %s3410_s18 = scalar_lea.vmem %s3672_s28, 1024  ;;  %p3415_p0 = scmp.lt.s32.totalorder %s3672_s28, %s3672_s28 }
  0x3e   :  { %p3411_p13 = scmp.ne.s32.totalorder %s3672_s28, %s3410_s18  ;;  %p3416_p1 = scmp.lt.s32.totalorder %s3410_s18, %s3410_s18 }
  0x40   :  { %p3417_p2 = por %p3416_p1, %p3415_p0 }
  0x42   :  { %p3418_p3 = pnand %p3417_p2, %p3411_p13 }
  0x44   :  { %3421 = shalt.err (!%p3418_p3)
}
  0x45   :  { %36 = dma.hbm_to_vmem [thread:$0]  %s4201_s0, 1024, %s3672_s28, [#allocation3], %s3546_s25, %s3546_s25, %s3547_s26  }
  0x46   :  { %s3550_s19 = smov [#allocation7]   ;;  %s3422_s16 = scalar_lea.hbm %s4203_s2, 6144 }
  0x47   :  { %s54_s20 = sshll.u32 %s3550_s19, 4  ;;  %p3423_p4 = scmp.ne.s32.totalorder %s4203_s2, %s3422_s16  ;;  %s55_s20 = int_to_ptr.vmem [resolvable:$true] %s54_s20 }
  0x48   :  { %p3426_p5 = scmp.lt.u32.totalorder %s3422_s16, %s4203_s2 }
  0x4a   :  { %p3428_p6 = pnand %p3426_p5, %p3423_p4 }
  0x4c   :  { %3431 = shalt.err (!%p3428_p6)
}
  0x4d   :  { %s3432_s27 = scalar_lea.vmem %s55_s20, 6144  ;;  %p3437_p8 = scmp.lt.s32.totalorder %s55_s20, %s55_s20 }
  0x4e   :  { %p3433_p7 = scmp.ne.s32.totalorder %s55_s20, %s3432_s27  ;;  %p3438_p9 = scmp.lt.s32.totalorder %s3432_s27, %s3432_s27 }
  0x50   :  { %p3439_p10 = por %p3438_p9, %p3437_p8 }
  0x52   :  { %p3440_p11 = pnand %p3439_p10, %p3433_p7 }
  0x54   :  { %3443 = shalt.err (!%p3440_p11)
}
  0x55   :  { %s3551_s0 = smov 384   ;;  %s3552_s28 = smov 24  }
  0x56   :  { %60 = dma.hbm_to_vmem [thread:$0]  %s4203_s2, 6144, %s55_s20, [#allocation6], %s3551_s0, %s3551_s0, %s3552_s28  }
  0x57   :  { %s3553_s17 = smov [#allocation10]   ;;  %s3554_s5 = smov [#allocation13]  }
  0x58   :  { %s78_s18 = sshll.u32 %s3553_s17, 4  ;;  %s102_s24 = sshll.u32 %s3554_s5, 4  ;;  %s79_s18 = int_to_ptr.vmem [resolvable:$true] %s78_s18  ;;  %s103_s24 = int_to_ptr.vmem [resolvable:$true] %s102_s24 }
  0x59   :  { %s3444_s3 = scalar_lea.hbm %s4205_s4, 1024 }
  0x5a   :  { %p3445_p12 = scmp.ne.s32.totalorder %s4205_s4, %s3444_s3  ;;  %p3448_p13 = scmp.lt.u32.totalorder %s3444_s3, %s4205_s4 }
  0x5c   :  { %p3450_p0 = pnand %p3448_p13, %p3445_p12 }
  0x5e   :  { %3453 = shalt.err (!%p3450_p0)
}
  0x5f   :  { %s3454_s2 = scalar_lea.vmem %s79_s18, 1024  ;;  %p3459_p2 = scmp.lt.s32.totalorder %s79_s18, %s79_s18 }
  0x60   :  { %p3455_p1 = scmp.ne.s32.totalorder %s79_s18, %s3454_s2  ;;  %p3460_p3 = scmp.lt.s32.totalorder %s3454_s2, %s3454_s2 }
  0x62   :  { %p3461_p4 = por %p3460_p3, %p3459_p2 }
  0x64   :  { %p3462_p5 = pnand %p3461_p4, %p3455_p1 }
  0x66   :  { %3465 = shalt.err (!%p3462_p5)
}
  0x67   :  { %84 = dma.hbm_to_vmem [thread:$0]  %s4205_s4, 1024, %s79_s18, [#allocation9], %s3546_s25, %s3546_s25, %s3547_s26  }
  0x68   :  { %s3466_s28 = scalar_lea.hbm %s4207_s6, 1024 }
  0x69   :  { %p3467_p6 = scmp.ne.s32.totalorder %s4207_s6, %s3466_s28  ;;  %p3470_p7 = scmp.lt.u32.totalorder %s3466_s28, %s4207_s6 }
  0x6b   :  { %p3472_p8 = pnand %p3470_p7, %p3467_p6 }
  0x6d   :  { %3475 = shalt.err (!%p3472_p8)
}
  0x6e   :  { %s3476_s19 = scalar_lea.vmem %s103_s24, 1024  ;;  %p3481_p10 = scmp.lt.s32.totalorder %s103_s24, %s103_s24 }
  0x6f   :  { %p3477_p9 = scmp.ne.s32.totalorder %s103_s24, %s3476_s19  ;;  %p3482_p11 = scmp.lt.s32.totalorder %s3476_s19, %s3476_s19 }
  0x71   :  { %p3483_p12 = por %p3482_p11, %p3481_p10 }
  0x73   :  { %p3484_p13 = pnand %p3483_p12, %p3477_p9 }
  0x75   :  { %3487 = shalt.err (!%p3484_p13)
}
  0x76   :  { %108 = dma.hbm_to_vmem [thread:$0]  %s4207_s6, 1024, %s103_s24, [#allocation12], %s3546_s25, %s3546_s25, %s3547_s26  }
  0x77   :  { %s3555_s21 = smov [#allocation14]   ;;  %s3488_s1 = scalar_lea.hbm %s4208_s7, 1024 }
  0x78   :  { %s114_s3 = sshll.u32 %s3555_s21, 4  ;;  %p3489_p0 = scmp.ne.s32.totalorder %s4208_s7, %s3488_s1  ;;  %s115_s3 = int_to_ptr.vmem [resolvable:$true] %s114_s3 }
  0x79   :  { %p3492_p1 = scmp.lt.u32.totalorder %s3488_s1, %s4208_s7 }
  0x7b   :  { %p3494_p2 = pnand %p3492_p1, %p3489_p0 }
  0x7d   :  { %3497 = shalt.err (!%p3494_p2)
}
  0x7e   :  { %s3498_s27 = scalar_lea.vmem %s115_s3, 1024  ;;  %p3503_p4 = scmp.lt.s32.totalorder %s115_s3, %s115_s3 }
  0x7f   :  { %p3499_p3 = scmp.ne.s32.totalorder %s115_s3, %s3498_s27  ;;  %p3504_p5 = scmp.lt.s32.totalorder %s3498_s27, %s3498_s27 }
  0x81   :  { %p3505_p6 = por %p3504_p5, %p3503_p4 }
  0x83   :  { %p3506_p7 = pnand %p3505_p6, %p3499_p3 }
  0x85   :  { %3509 = shalt.err (!%p3506_p7)
}
  0x86   :  { %120 = dma.hbm_to_vmem [thread:$0]  %s4208_s7, 1024, %s115_s3, [#allocation15], %s3546_s25, %s3546_s25, %s3547_s26  }
  0x87   :  { %3532 = dma.done.wait [#allocation3], 1024  }
  0x88   :  { %3533 = vsyncadd [#allocation3], 4294966272 }
  0x89   :  { %3534 = dma.done.wait [#allocation6], 7168  }
  0x8a   :  { %3535 = vsyncadd [#allocation6], 4294960128 }
  0x8b   :  { %3536 = dma.done.wait [#allocation9], 2048  }
  0x8c   :  { %3537 = vsyncadd [#allocation9], 4294965248 }
  0x8d   :  { %3538 = dma.done.wait [#allocation12], 2048  }
  0x8e   :  { %3539 = vsyncadd [#allocation12], 4294965248 }
  0x8f   :  { %3540 = dma.done.wait [#allocation15], 1024  }
  0x90   :  { %3541 = vsyncadd [#allocation15], 4294966272  ;;  %v4216_v0 = vmov 0   ;;  %v3135_v1 = vld [vmem:[#allocation7 + $0x4] ss:$24 sps:$4 sm:$0xff]   ;;  %v3772_v29 = vld [vmem:[#allocation5 + $0x8] sm:$0xff]  }
  0x91   :  { %558 = vmatprep.mubr.bf16.mxu0 %v4216_v0  ;;  %671 = vmatprep.mubr.bf16.mxu1 %v4216_v0  ;;  %v3137_v2 = vld [vmem:[#allocation7] ss:$24 sps:$4 sm:$0xff]   ;;  %v3138_v3 = vld [vmem:[#allocation7 + $0x34] ss:$24 sps:$4 sm:$0xff]   ;;  %v3140_v4 = vld [vmem:[#allocation7 + $0x30] ss:$24 sps:$4 sm:$0xff]  }
  0x92   :  { %526 = vmatprep.subr.bf16.mxu0 %v3135_v1  ;;  %v3141_v5 = vld [vmem:[#allocation7 + $0x64] ss:$24 sps:$4 sm:$0xff]   ;;  %v3143_v6 = vld [vmem:[#allocation7 + $0x60] ss:$24 sps:$4 sm:$0xff]   ;;  %v3144_v7 = vld [vmem:[#allocation7 + $0x94] ss:$24 sps:$4 sm:$0xff]  }
  0x93   :  { %527 = vmatpush1.bf16.msra.mxu0 %v3137_v2  ;;  %v3146_v8 = vld [vmem:[#allocation7 + $0x90] ss:$24 sps:$4 sm:$0xff]   ;;  %v3147_v9 = vld [vmem:[#allocation7 + $0xc4] ss:$24 sps:$4 sm:$0xff]   ;;  %v3149_v10 = vld [vmem:[#allocation7 + $0xc0] ss:$24 sps:$4 sm:$0xff]  }
  0x94   :  { %528 = vmatprep.subr.bf16.mxu0 %v3138_v3  ;;  %v3150_v11 = vld [vmem:[#allocation7 + $0xf4] ss:$24 sps:$4 sm:$0xff]   ;;  %v3152_v12 = vld [vmem:[#allocation7 + $0xf0] ss:$24 sps:$4 sm:$0xff]   ;;  %v3153_v13 = vld [vmem:[#allocation7 + $0x124] ss:$24 sps:$4 sm:$0xff]  }
  0x95   :  { %v3167_v14 = vld [vmem:[#allocation7 + $0xc] ss:$24 sps:$4 sm:$0xff]   ;;  %v3169_v15 = vld [vmem:[#allocation7 + $0x8] ss:$24 sps:$4 sm:$0xff]   ;;  %v3170_v16 = vld [vmem:[#allocation7 + $0x3c] ss:$24 sps:$4 sm:$0xff]  }
  0x96   :  { %639 = vmatprep.subr.bf16.mxu1 %v3167_v14  ;;  %v3172_v17 = vld [vmem:[#allocation7 + $0x38] ss:$24 sps:$4 sm:$0xff]   ;;  %v3173_v19 = vld [vmem:[#allocation7 + $0x6c] ss:$24 sps:$4 sm:$0xff]   ;;  %v3175_v21 = vld [vmem:[#allocation7 + $0x68] ss:$24 sps:$4 sm:$0xff]  }
  0x97   :  { %529 = vmatpush1.bf16.msra.mxu0 %v3140_v4  ;;  %640 = vmatpush1.bf16.msra.mxu1 %v3169_v15  ;;  %v3155_v18 = vld [vmem:[#allocation7 + $0x120] ss:$24 sps:$4 sm:$0xff]   ;;  %v3156_v20 = vld [vmem:[#allocation7 + $0x154] ss:$24 sps:$4 sm:$0xff]   ;;  %v3158_v22 = vld [vmem:[#allocation7 + $0x150] ss:$24 sps:$4 sm:$0xff]  }
  0x98   :  { %530 = vmatprep.subr.bf16.mxu0 %v3141_v5  ;;  %641 = vmatprep.subr.bf16.mxu1 %v3170_v16  ;;  %v3176_v23 = vld [vmem:[#allocation7 + $0x9c] ss:$24 sps:$4 sm:$0xff]   ;;  %v3768_v24 = vld [vmem:[#allocation5] sm:$0xff]   ;;  %v3178_v25 = vld [vmem:[#allocation7 + $0x98] ss:$24 sps:$4 sm:$0xff]  }
  0x99   :  { %v3179_v26 = vld [vmem:[#allocation7 + $0xcc] ss:$24 sps:$4 sm:$0xff]   ;;  %v3181_v27 = vld [vmem:[#allocation7 + $0xc8] ss:$24 sps:$4 sm:$0xff]   ;;  %v3182_v28 = vld [vmem:[#allocation7 + $0xfc] ss:$24 sps:$4 sm:$0xff]  }
  0x9a   :  { %v3184_v30 = vld [vmem:[#allocation7 + $0xf8] ss:$24 sps:$4 sm:$0xff]   ;;  %v3185_v31 = vld [vmem:[#allocation7 + $0x12c] ss:$24 sps:$4 sm:$0xff]   ;;  %v3187_v32 = vld [vmem:[#allocation7 + $0x128] ss:$24 sps:$4 sm:$0xff]  }
  0x9b   :  { %531 = vmatpush1.bf16.msra.mxu0 %v3143_v6  ;;  %642 = vmatpush1.bf16.msra.mxu1 %v3172_v17  ;;  %v3188_v33 = vld [vmem:[#allocation7 + $0x15c] ss:$24 sps:$4 sm:$0xff]   ;;  %v3190_v35 = vld [vmem:[#allocation7 + $0x158] ss:$24 sps:$4 sm:$0xff]   ;;  %v3786_v37 = vld [vmem:[#allocation5 + $0x20] sm:$0xff]  }
  0x9c   :  { %532 = vmatprep.subr.bf16.mxu0 %v3144_v7  ;;  %643 = vmatprep.subr.bf16.mxu1 %v3173_v19  ;;  %v3776_v34 = vld [vmem:[#allocation5 + $0x10] sm:$0xff]   ;;  %v3780_v36 = vld [vmem:[#allocation5 + $0x18] sm:$0xff]   ;;  %v3793_v38 = vld [vmem:[#allocation5 + $0x28] sm:$0xff]  }
  0x9d   :  { %v3799_v39 = vld [vmem:[#allocation5 + $0x30] sm:$0xff]   ;;  %v3805_v40 = vld [vmem:[#allocation5 + $0x38] sm:$0xff]   ;;  %v3815_v41 = vld [vmem:[#allocation2] sm:$0xff]  }
  0x9f   :  { %533 = vmatpush1.bf16.msra.mxu0 %v3146_v8  ;;  %644 = vmatpush1.bf16.msra.mxu1 %v3175_v21 }
  0xa0   :  { %534 = vmatprep.subr.bf16.mxu0 %v3147_v9  ;;  %645 = vmatprep.subr.bf16.mxu1 %v3176_v23 }
  0xa3   :  { %535 = vmatpush1.bf16.msra.mxu0 %v3149_v10  ;;  %646 = vmatpush1.bf16.msra.mxu1 %v3178_v25 }
  0xa4   :  { %536 = vmatprep.subr.bf16.mxu0 %v3150_v11  ;;  %647 = vmatprep.subr.bf16.mxu1 %v3179_v26 }
  0xa7   :  { %537 = vmatpush1.bf16.msra.mxu0 %v3152_v12  ;;  %648 = vmatpush1.bf16.msra.mxu1 %v3181_v27 }
  0xa8   :  { %538 = vmatprep.subr.bf16.mxu0 %v3153_v13  ;;  %649 = vmatprep.subr.bf16.mxu1 %v3182_v28 }
  0xab   :  { %539 = vmatpush1.bf16.msra.mxu0 %v3155_v18  ;;  %650 = vmatpush1.bf16.msra.mxu1 %v3184_v30 }
  0xac   :  { %540 = vmatprep.subr.bf16.mxu0 %v3156_v20  ;;  %651 = vmatprep.subr.bf16.mxu1 %v3185_v31 }
  0xaf   :  { %541 = vmatpush1.bf16.msra.mxu0 %v3158_v22  ;;  %652 = vmatpush1.bf16.msra.mxu1 %v3187_v32 }
  0xb0   :  { %653 = vmatprep.subr.bf16.mxu1 %v3188_v33 }
  0xb2   :  { %559 = vmatmul.mubr.bf16.vlgmr.msra.gmra.mrb[0].mxu0 %v3768_v24 }
  0xb3   :  { %568 = vmatprep.mubr.bf16.mxu0 %v4216_v0  ;;  %654 = vmatpush1.bf16.msra.mxu1 %v3190_v35 }
  0xb6   :  { %672 = vmatmul.mubr.bf16.vlgmr.msra.gmra.mrb[0].mxu1 %v3768_v24 }
  0xb7   :  { %681 = vmatprep.mubr.bf16.mxu1 %v4216_v0 }
  0xba   :  { %569 = vmatmul.mubr.bf16.gmra.mrb[4].mxu0 %v3772_v29 }
  0xbb   :  { %578 = vmatprep.mubr.bf16.mxu0 %v4216_v0 }
  0xbe   :  { %682 = vmatmul.mubr.bf16.gmra.mrb[4].mxu1 %v3772_v29 }
  0xbf   :  { %691 = vmatprep.mubr.bf16.mxu1 %v4216_v0 }
  0xc2   :  { %579 = vmatmul.mubr.bf16.gmra.mrb[8].mxu0 %v3776_v34 }
  0xc3   :  { %588 = vmatprep.mubr.bf16.mxu0 %v4216_v0 }
  0xc6   :  { %692 = vmatmul.mubr.bf16.gmra.mrb[8].mxu1 %v3776_v34 }
  0xc7   :  { %701 = vmatprep.mubr.bf16.mxu1 %v4216_v0 }
  0xca   :  { %589 = vmatmul.mubr.bf16.gmra.mrb[12].mxu0 %v3780_v36 }
  0xcb   :  { %598 = vmatprep.mubr.bf16.mxu0 %v4216_v0 }
  0xce   :  { %702 = vmatmul.mubr.bf16.gmra.mrb[12].mxu1 %v3780_v36 }
  0xcf   :  { %711 = vmatprep.mubr.bf16.mxu1 %v4216_v0 }
  0xd2   :  { %599 = vmatmul.mubr.bf16.gmra.mrb[16].mxu0 %v3786_v37 }
  0xd3   :  { %608 = vmatprep.mubr.bf16.mxu0 %v4216_v0 }
  0xd6   :  { %712 = vmatmul.mubr.bf16.gmra.mrb[16].mxu1 %v3786_v37 }
  0xd7   :  { %721 = vmatprep.mubr.bf16.mxu1 %v4216_v0 }
  0xda   :  { %609 = vmatmul.mubr.bf16.gmra.mrb[20].mxu0 %v3793_v38 }
  0xdb   :  { %618 = vmatprep.mubr.bf16.mxu0 %v4216_v0 }
  0xde   :  { %722 = vmatmul.mubr.bf16.gmra.mrb[20].mxu1 %v3793_v38 }
  0xdf   :  { %731 = vmatprep.mubr.bf16.mxu1 %v4216_v0 }
  0xe2   :  { %619 = vmatmul.mubr.bf16.gmra.mrb[24].mxu0 %v3799_v39 }
  0xe3   :  { %628 = vmatprep.mubr.bf16.mxu0 %v4216_v0 }
  0xe6   :  { %732 = vmatmul.mubr.bf16.gmra.mrb[24].mxu1 %v3799_v39 }
  0xe7   :  { %741 = vmatprep.mubr.bf16.mxu1 %v4216_v0 }
  0xea   :  { %629 = vmatmul.mubr.bf16.gmra.mrb[28].mxu0 %v3805_v40 }
  0xeb   :  { %784 = vmatprep.mubr.bf16.mxu0 %v4216_v0  ;;  %v3922_v0 = vld [vmem:[#allocation2 + $0x28] sm:$0xff]  }
  0xee   :  { %742 = vmatmul.mubr.bf16.gmra.mrb[28].mxu1 %v3805_v40 }
  0xef   :  { %2831 = vmatprep.mubr.bf16.mxu1 %v3815_v41 }
 0x185   :  { %v560_v42 = vpop.f32.mrb[0].mxu0 }
 0x186   :  { %v3818_v43 = vpop.f32.mrb[1].mxu0 }
 0x187   :  { %v564_v44 = vpop.f32.mrb[2].mxu0 }
 0x188   :  { %v865_v45 = vpack.c.bf16 %v564_v44, %v560_v42  ;;  %v3820_v46 = vpop.f32.mrb[3].mxu0 }
 0x189   :  { %v3830_v57 = vpop.f32.mrb[0].mxu1 }
 0x18a   :  { %2815 = vmatprep.subr.bf16.mxu1 %v865_v45  ;;  %v3832_v58 = vpop.f32.mrb[1].mxu1 }
 0x18b   :  { %2816 = vmatpush3.bf16.msra.mxu1 %v865_v45  ;;  %4218 = vst [vmem:[#allocation23_spill] sm:$0xff] %v3832_v58  ;;  %v3834_v59 = vpop.f32.mrb[2].mxu1 }
 0x18c   :  { %v3836_v60 = vpop.f32.mrb[3].mxu1 }
 0x18d   :  { %v570_v47 = vpop.f32.mrb[4].mxu0  ;;  %4219 = vst [vmem:[#allocation24_spill] sm:$0xff] %v3836_v60 }
 0x18e   :  { %v3822_v48 = vpop.f32.mrb[5].mxu0 }
 0x18f   :  { %v574_v49 = vpop.f32.mrb[6].mxu0 }
 0x190   :  { %v866_v50 = vpack.c.bf16 %v574_v49, %v570_v47  ;;  %v3824_v51 = vpop.f32.mrb[7].mxu0 }
 0x191   :  { %v3842_v3 = vpop.f32.mrb[4].mxu1 }
 0x192   :  { %2817 = vmatprep.subr.bf16.mxu1 %v866_v50  ;;  %v3844_v4 = vpop.f32.mrb[5].mxu1 }
 0x193   :  { %2818 = vmatpush3.bf16.msra.mxu1 %v866_v50  ;;  %v3846_v5 = vpop.f32.mrb[6].mxu1 }
 0x194   :  { %v3848_v6 = vpop.f32.mrb[7].mxu1 }
 0x195   :  { %v580_v52 = vpop.f32.mrb[8].mxu0  ;;  %4220 = vst [vmem:[#allocation25_spill] sm:$0xff] %v3848_v6 }
 0x196   :  { %v3826_v53 = vpop.f32.mrb[9].mxu0 }
 0x197   :  { %v584_v54 = vpop.f32.mrb[10].mxu0 }
 0x198   :  { %v867_v55 = vpack.c.bf16 %v584_v54, %v580_v52  ;;  %v3828_v56 = vpop.f32.mrb[11].mxu0  ;;  %v3199_v54 = vld [vmem:[#allocation8] sm:$0xff]  }
 0x199   :  { %v3854_v12 = vpop.f32.mrb[8].mxu1 }
 0x19a   :  { %2819 = vmatprep.subr.bf16.mxu1 %v867_v55  ;;  %v3856_v13 = vpop.f32.mrb[9].mxu1 }
 0x19b   :  { %2820 = vmatpush3.bf16.msra.mxu1 %v867_v55  ;;  %4221 = vst [vmem:[#allocation26_spill] sm:$0xff] %v3856_v13  ;;  %v3858_v14 = vpop.f32.mrb[10].mxu1  ;;  %v3221_v13 = vld [vmem:[#allocation7 + $0xd4] ss:$24 sps:$4 sm:$0xff]  }
 0x19c   :  { %v3860_v15 = vpop.f32.mrb[11].mxu1 }
 0x19d   :  { %v590_v61 = vpop.f32.mrb[12].mxu0  ;;  %4222 = vst [vmem:[#allocation27_spill] sm:$0xff] %v3860_v15  ;;  %v3213_v15 = vld [vmem:[#allocation7 + $0x70] ss:$24 sps:$4 sm:$0xff]  }
 0x19e   :  { %v3838_v62 = vpop.f32.mrb[13].mxu0 }
 0x19f   :  { %v594_v63 = vpop.f32.mrb[14].mxu0 }
 0x1a0   :  { %v868_v1 = vpack.c.bf16 %v594_v63, %v590_v61  ;;  %v3840_v2 = vpop.f32.mrb[15].mxu0  ;;  %v3894_v61 = vld [vmem:[#allocation2 + $0x8] sm:$0xff]  }
 0x1a1   :  { %v3866_v21 = vpop.f32.mrb[12].mxu1 }
 0x1a2   :  { %2821 = vmatprep.subr.bf16.mxu1 %v868_v1  ;;  %v3868_v22 = vpop.f32.mrb[13].mxu1 }
 0x1a3   :  { %2822 = vmatpush3.bf16.msra.mxu1 %v868_v1  ;;  %4223 = vst [vmem:[#allocation28_spill] sm:$0xff] %v3868_v22  ;;  %v3870_v23 = vpop.f32.mrb[14].mxu1  ;;  %v3898_v1 = vld [vmem:[#allocation2 + $0x10] sm:$0xff]   ;;  %v3222_v22 = vld [vmem:[#allocation7 + $0x100] ss:$24 sps:$4 sm:$0xff]  }
 0x1a4   :  { %v3872_v25 = vpop.f32.mrb[15].mxu1 }
 0x1a5   :  { %v600_v7 = vpop.f32.mrb[16].mxu0  ;;  %4224 = vst [vmem:[#allocation29_spill] sm:$0xff] %v3872_v25  ;;  %v3216_v25 = vld [vmem:[#allocation7 + $0xa0] ss:$24 sps:$4 sm:$0xff]  }
 0x1a6   :  { %v3850_v8 = vpop.f32.mrb[17].mxu0 }
 0x1a7   :  { %v604_v9 = vpop.f32.mrb[18].mxu0 }
 0x1a8   :  { %v869_v10 = vpack.c.bf16 %v604_v9, %v600_v7  ;;  %v3852_v11 = vpop.f32.mrb[19].mxu0  ;;  %v3200_v9 = vld [vmem:[#allocation8 + $0x8] sm:$0xff]  }
 0x1a9   :  { %v3878_v32 = vpop.f32.mrb[16].mxu1 }
 0x1aa   :  { %2823 = vmatprep.subr.bf16.mxu1 %v869_v10  ;;  %v3880_v33 = vpop.f32.mrb[17].mxu1 }
 0x1ab   :  { %2824 = vmatpush3.bf16.msra.mxu1 %v869_v10  ;;  %4225 = vst [vmem:[#allocation30_spill] sm:$0xff] %v3880_v33  ;;  %v3882_v35 = vpop.f32.mrb[18].mxu1  ;;  %v3212_v33 = vld [vmem:[#allocation7 + $0x44] ss:$24 sps:$4 sm:$0xff]  }
 0x1ac   :  { %v3884_v42 = vpop.f32.mrb[19].mxu1 }
 0x1ad   :  { %v610_v16 = vpop.f32.mrb[20].mxu0  ;;  %4226 = vst [vmem:[#allocation31_spill] sm:$0xff] %v3884_v42  ;;  %v3926_v42 = vld [vmem:[#allocation2 + $0x30] sm:$0xff]  }
 0x1ae   :  { %v3862_v17 = vpop.f32.mrb[21].mxu0 }
 0x1af   :  { %v614_v18 = vpop.f32.mrb[22].mxu0 }
 0x1b0   :  { %v870_v19 = vpack.c.bf16 %v614_v18, %v610_v16  ;;  %v3864_v20 = vpop.f32.mrb[23].mxu0  ;;  %v3201_v16 = vld [vmem:[#allocation8 + $0x10] sm:$0xff]  }
 0x1b1   :  { %v3890_v52 = vpop.f32.mrb[20].mxu1 }
 0x1b2   :  { %2825 = vmatprep.subr.bf16.mxu1 %v870_v19  ;;  %v3892_v55 = vpop.f32.mrb[21].mxu1 }
 0x1b3   :  { %2826 = vmatpush3.bf16.msra.mxu1 %v870_v19  ;;  %4227 = vst [vmem:[#allocation32_spill] sm:$0xff] %v3892_v55  ;;  %v3896_v63 = vpop.f32.mrb[22].mxu1  ;;  %v3908_v19 = vld [vmem:[#allocation2 + $0x18] sm:$0xff]  }
 0x1b4   :  { %v3900_v7 = vpop.f32.mrb[23].mxu1  ;;  %v3210_v55 = vld [vmem:[#allocation7 + $0x40] ss:$24 sps:$4 sm:$0xff]  }
 0x1b5   :  { %v620_v26 = vpop.f32.mrb[24].mxu0  ;;  %4228 = vst [vmem:[#allocation33_spill] sm:$0xff] %v3900_v7  ;;  %v3206_v7 = vld [vmem:[#allocation8 + $0x38] sm:$0xff]  }
 0x1b6   :  { %v3874_v27 = vpop.f32.mrb[25].mxu0 }
 0x1b7   :  { %v624_v28 = vpop.f32.mrb[26].mxu0 }
 0x1b8   :  { %v871_v30 = vpack.c.bf16 %v624_v28, %v620_v26  ;;  %v3876_v31 = vpop.f32.mrb[27].mxu0  ;;  %v3912_v28 = vld [vmem:[#allocation2 + $0x20] sm:$0xff]  }
 0x1b9   :  { %v3904_v10 = vpop.f32.mrb[24].mxu1 }
 0x1ba   :  { %2827 = vmatprep.subr.bf16.mxu1 %v871_v30  ;;  %v3906_v18 = vpop.f32.mrb[25].mxu1 }
 0x1bb   :  { %2828 = vmatpush3.bf16.msra.mxu1 %v871_v30  ;;  %4229 = vst [vmem:[#allocation34_spill] sm:$0xff] %v3906_v18  ;;  %v3910_v26 = vpop.f32.mrb[26].mxu1 }
 0x1bc   :  { %v3914_v30 = vpop.f32.mrb[27].mxu1 }
 0x1bd   :  { %v630_v44 = vpop.f32.mrb[28].mxu0  ;;  %4230 = vst [vmem:[#allocation35_spill] sm:$0xff] %v3914_v30  ;;  %v3204_v30 = vld [vmem:[#allocation8 + $0x28] sm:$0xff]  }
 0x1be   :  { %v3886_v45 = vpop.f32.mrb[29].mxu0 }
 0x1bf   :  { %v634_v47 = vpop.f32.mrb[30].mxu0 }
 0x1c0   :  { %v872_v49 = vpack.c.bf16 %v634_v47, %v630_v44  ;;  %v3888_v50 = vpop.f32.mrb[31].mxu0  ;;  %v3202_v44 = vld [vmem:[#allocation8 + $0x18] sm:$0xff]  }
 0x1c1   :  { %v3918_v47 = vpop.f32.mrb[28].mxu1 }
 0x1c2   :  { %2829 = vmatprep.subr.bf16.mxu1 %v872_v49 }
 0x1c3   :  { %2830 = vmatpush3.bf16.msra.mxu1 %v872_v49  ;;  %v3203_v49 = vld [vmem:[#allocation8 + $0x20] sm:$0xff]  }
 0x1c4   :  { %2847 = vmatprep.subr.bf16.mxu1 %v3199_v54 }
 0x1c6   :  { %2832 = vmatmul.mubr.bf16.vlgmr.msra.gmra.mrb[32].mxu1 %v3894_v61 }
 0x1c7   :  { %2835 = vmatprep.mubr.bf16.mxu1 %v3898_v1  ;;  %2848 = vmatpush3.bf16.msra.mxu1 %v3199_v54  ;;  %v3920_v54 = vpop.f32.mrb[29].mxu1 }
 0x1c8   :  { %2849 = vmatprep.subr.bf16.mxu1 %v3200_v9  ;;  %4231 = vst [vmem:[#allocation36_spill] sm:$0xff] %v3920_v54  ;;  %v3924_v18 = vpop.f32.mrb[30].mxu1  ;;  %v3205_v54 = vld [vmem:[#allocation8 + $0x30] sm:$0xff]  }
 0x1cb   :  { %2850 = vmatpush3.bf16.msra.mxu1 %v3200_v9  ;;  %v3928_v9 = vpop.f32.mrb[31].mxu1 }
 0x1cc   :  { %2851 = vmatprep.subr.bf16.mxu1 %v3201_v16  ;;  %4232 = vst [vmem:[#allocation37_spill] sm:$0xff] %v3928_v9  ;;  %v3209_v9 = vld [vmem:[#allocation7 + $0x14] ss:$24 sps:$4 sm:$0xff]  }
 0x1cd   :  { %752 = vmatprep.subr.bf16.mxu0 %v3209_v9  ;;  %v3227_v9 = vld [vmem:[#allocation7 + $0x134] ss:$24 sps:$4 sm:$0xff]  }
 0x1ce   :  { %2836 = vmatmul.mubr.bf16.gmra.mrb[36].mxu1 %v3908_v19 }
 0x1cf   :  { %2839 = vmatprep.mubr.bf16.mxu1 %v3912_v28  ;;  %2852 = vmatpush3.bf16.msra.mxu1 %v3201_v16  ;;  %v3932_v16 = vld [vmem:[#allocation2 + $0x38] sm:$0xff]  }
 0x1d0   :  { %2853 = vmatprep.subr.bf16.mxu1 %v3202_v44 }
 0x1d3   :  { %2854 = vmatpush3.bf16.msra.mxu1 %v3202_v44  ;;  %v3207_v44 = vld [vmem:[#allocation7 + $0x10] ss:$24 sps:$4 sm:$0xff]  }
 0x1d4   :  { %2855 = vmatprep.subr.bf16.mxu1 %v3203_v49  ;;  %753 = vmatpush1.bf16.msra.mxu0 %v3207_v44  ;;  %v3225_v44 = vld [vmem:[#allocation7 + $0x130] ss:$24 sps:$4 sm:$0xff]  }
 0x1d5   :  { %754 = vmatprep.subr.bf16.mxu0 %v3212_v33  ;;  %v3230_v33 = vld [vmem:[#allocation7 + $0x164] ss:$24 sps:$4 sm:$0xff]  }
 0x1d6   :  { %2840 = vmatmul.mubr.bf16.gmra.mrb[40].mxu1 %v3922_v0 }
 0x1d7   :  { %2843 = vmatprep.mubr.bf16.mxu1 %v3926_v42  ;;  %2856 = vmatpush3.bf16.msra.mxu1 %v3203_v49  ;;  %v3215_v49 = vld [vmem:[#allocation7 + $0x74] ss:$24 sps:$4 sm:$0xff]  }
 0x1d8   :  { %2857 = vmatprep.subr.bf16.mxu1 %v3204_v30  ;;  %755 = vmatpush1.bf16.msra.mxu0 %v3210_v55  ;;  %v3228_v55 = vld [vmem:[#allocation7 + $0x160] ss:$24 sps:$4 sm:$0xff]  }
 0x1d9   :  { %756 = vmatprep.subr.bf16.mxu0 %v3215_v49 }
 0x1db   :  { %2858 = vmatpush3.bf16.msra.mxu1 %v3204_v30  ;;  %v3218_v30 = vld [vmem:[#allocation7 + $0xa4] ss:$24 sps:$4 sm:$0xff]  }
 0x1dc   :  { %2859 = vmatprep.subr.bf16.mxu1 %v3205_v54  ;;  %757 = vmatpush1.bf16.msra.mxu0 %v3213_v15  ;;  %v4233_v15 = vmov 0  }
 0x1dd   :  { %758 = vmatprep.subr.bf16.mxu0 %v3218_v30 }
 0x1de   :  { %2844 = vmatmul.mubr.bf16.gmra.mrb[44].mxu1 %v3932_v16 }
 0x1df   :  { %2860 = vmatpush3.bf16.msra.mxu1 %v3205_v54  ;;  %v3219_v54 = vld [vmem:[#allocation7 + $0xd0] ss:$24 sps:$4 sm:$0xff]  }
 0x1e0   :  { %2861 = vmatprep.subr.bf16.mxu1 %v3206_v7  ;;  %759 = vmatpush1.bf16.msra.mxu0 %v3216_v25 }
 0x1e1   :  { %760 = vmatprep.subr.bf16.mxu0 %v3221_v13 }
 0x1e3   :  { %2862 = vmatpush3.bf16.msra.mxu1 %v3206_v7  ;;  %v3224_v7 = vld [vmem:[#allocation7 + $0x104] ss:$24 sps:$4 sm:$0xff]  }
 0x1e4   :  { %761 = vmatpush1.bf16.msra.mxu0 %v3219_v54 }
 0x1e5   :  { %762 = vmatprep.subr.bf16.mxu0 %v3224_v7 }
 0x1e8   :  { %763 = vmatpush1.bf16.msra.mxu0 %v3222_v22 }
 0x1e9   :  { %764 = vmatprep.subr.bf16.mxu0 %v3227_v9 }
 0x1ec   :  { %765 = vmatpush1.bf16.msra.mxu0 %v3225_v44 }
 0x1ed   :  { %766 = vmatprep.subr.bf16.mxu0 %v3230_v33 }
 0x1f0   :  { %767 = vmatpush1.bf16.msra.mxu0 %v3228_v55 }
 0x1f3   :  { %785 = vmatmul.mubr.bf16.vlgmr.msra.gmra.mrb[32].mxu0 %v3768_v24  ;;  %v2601_v24 = vld [vmem:[%s4209_s8] ss:$0 sm:$0xff] }
 0x1f4   :  { %794 = vmatprep.mubr.bf16.mxu0 %v4233_v15 }
 0x1fb   :  { %795 = vmatmul.mubr.bf16.gmra.mrb[36].mxu0 %v3772_v29 }
 0x1fc   :  { %804 = vmatprep.mubr.bf16.mxu0 %v4233_v15 }
 0x203   :  { %805 = vmatmul.mubr.bf16.gmra.mrb[40].mxu0 %v3776_v34 }
 0x204   :  { %814 = vmatprep.mubr.bf16.mxu0 %v4233_v15 }
 0x20b   :  { %815 = vmatmul.mubr.bf16.gmra.mrb[44].mxu0 %v3780_v36 }
 0x20c   :  { %824 = vmatprep.mubr.bf16.mxu0 %v4233_v15 }
 0x213   :  { %825 = vmatmul.mubr.bf16.gmra.mrb[48].mxu0 %v3786_v37 }
 0x214   :  { %834 = vmatprep.mubr.bf16.mxu0 %v4233_v15 }
 0x21b   :  { %835 = vmatmul.mubr.bf16.gmra.mrb[52].mxu0 %v3793_v38 }
 0x21c   :  { %844 = vmatprep.mubr.bf16.mxu0 %v4233_v15 }
 0x223   :  { %845 = vmatmul.mubr.bf16.gmra.mrb[56].mxu0 %v3799_v39 }
 0x224   :  { %854 = vmatprep.mubr.bf16.mxu0 %v4233_v15 }
 0x22b   :  { %855 = vmatmul.mubr.bf16.gmra.mrb[60].mxu0 %v3805_v40 }
 0x22c   :  { %2895 = vmatprep.mubr.bf16.mxu0 %v3815_v41 }
 0x299   :  { %v2833_v29 = vpop.f32.mrb[32].mxu1 }
 0x29a   :  { %v971_v34 = vadd.f32 %v2833_v29, %v2601_v24  ;;  %v962_v36 = vpop.f32.mrb[33].mxu1 }
 0x29b   :  { %v963_v37 = vadd.f32 %v2601_v24, %v962_v36  ;;  %v2834_v13 = vpop.f32.mrb[34].mxu1 }
 0x29c   :  { %v974_v38 = vadd.f32 %v2834_v13, %v2601_v24  ;;  %v965_v22 = vpop.f32.mrb[35].mxu1  ;;  %v1027_v49 = vmax.f32 %v971_v34, 0.0 }
 0x29d   :  { %v966_v25 = vadd.f32 %v2601_v24, %v965_v22  ;;  %v1025_v30 = vmax.f32 %v963_v37, 0.0 }
 0x29e   :  { %v1028_v39 = vmax.f32 %v974_v38, 0.0 }
 0x29f   :  { %v1026_v54 = vmax.f32 %v966_v25, 0.0 }
 0x2a0   :  { %v1042_v7 = vpack.c.bf16 %v1028_v39, %v1027_v49 }
 0x2a1   :  { %v1041_v40 = vpack.c.bf16 %v1026_v54, %v1025_v30  ;;  %v2837_v9 = vpop.f32.mrb[36].mxu1 }
 0x2a2   :  { %v987_v44 = vadd.f32 %v2837_v9, %v2601_v24  ;;  %v978_v33 = vpop.f32.mrb[37].mxu1 }
 0x2a3   :  { %v979_v55 = vadd.f32 %v2601_v24, %v978_v33  ;;  %v2838_v15 = vpop.f32.mrb[38].mxu1  ;;  %2863 = vmatprep.mubr.bf16.mxu1 %v1041_v40 }
 0x2a4   :  { %v990_v60 = vadd.f32 %v2838_v15, %v2601_v24  ;;  %v981_v29 = vpop.f32.mrb[39].mxu1  ;;  %2864 = vmatmul.mubr.bf16.vlgmr.msra.gmra.mrb[48].mxu1 %v1042_v7  ;;  %v1031_v6 = vmax.f32 %v987_v44, 0.0 }
 0x2a5   :  { %v982_v36 = vadd.f32 %v2601_v24, %v981_v29  ;;  %v1029_v58 = vmax.f32 %v979_v55, 0.0 }
 0x2a6   :  { %v1032_v13 = vmax.f32 %v990_v60, 0.0 }
 0x2a7   :  { %v1030_v22 = vmax.f32 %v982_v36, 0.0 }
 0x2a8   :  { %v1044_v34 = vpack.c.bf16 %v1032_v13, %v1031_v6 }
 0x2a9   :  { %v1043_v38 = vpack.c.bf16 %v1030_v22, %v1029_v58  ;;  %v2841_v37 = vpop.f32.mrb[40].mxu1 }
 0x2aa   :  { %v1003_v25 = vadd.f32 %v2841_v37, %v2601_v24  ;;  %v994_v49 = vpop.f32.mrb[41].mxu1 }
 0x2ab   :  { %v995_v39 = vadd.f32 %v2601_v24, %v994_v49  ;;  %v2842_v30 = vpop.f32.mrb[42].mxu1  ;;  %2867 = vmatprep.mubr.bf16.mxu1 %v1043_v38 }
 0x2ac   :  { %v1006_v54 = vadd.f32 %v2842_v30, %v2601_v24  ;;  %v997_v9 = vpop.f32.mrb[43].mxu1  ;;  %2868 = vmatmul.mubr.bf16.gmra.mrb[52].mxu1 %v1044_v34  ;;  %v1035_v33 = vmax.f32 %v1003_v25, 0.0 }
 0x2ad   :  { %v998_v40 = vadd.f32 %v2601_v24, %v997_v9  ;;  %v1033_v7 = vmax.f32 %v995_v39, 0.0 }
 0x2ae   :  { %v1036_v15 = vmax.f32 %v1006_v54, 0.0 }
 0x2af   :  { %v1034_v29 = vmax.f32 %v998_v40, 0.0  ;;  %v3231_v40 = vld [vmem:[#allocation10] sm:$0xff]  }
 0x2b0   :  { %v1046_v44 = vpack.c.bf16 %v1036_v15, %v1035_v33  ;;  %v3232_v33 = vld [vmem:[#allocation10 + $0x8] sm:$0xff]   ;;  %2911 = vmatprep.subr.bf16.mxu1 %v3231_v40 }
 0x2b1   :  { %v1045_v60 = vpack.c.bf16 %v1034_v29, %v1033_v7  ;;  %v2845_v55 = vpop.f32.mrb[44].mxu1  ;;  %2912 = vmatpush3.bf16.msra.mxu1 %v3231_v40 }
 0x2b2   :  { %v1019_v36 = vadd.f32 %v2845_v55, %v2601_v24  ;;  %v1010_v6 = vpop.f32.mrb[45].mxu1  ;;  %2913 = vmatprep.subr.bf16.mxu1 %v3232_v33 }
 0x2b3   :  { %v1011_v58 = vadd.f32 %v2601_v24, %v1010_v6  ;;  %v2846_v13 = vpop.f32.mrb[46].mxu1  ;;  %2871 = vmatprep.mubr.bf16.mxu1 %v1045_v60  ;;  %v3234_v6 = vld [vmem:[#allocation10 + $0x18] sm:$0xff]  }
 0x2b4   :  { %v1022_v22 = vadd.f32 %v2846_v13, %v2601_v24  ;;  %v1013_v37 = vpop.f32.mrb[47].mxu1  ;;  %2872 = vmatmul.mubr.bf16.gmra.mrb[56].mxu1 %v1046_v44  ;;  %v1039_v49 = vmax.f32 %v1019_v36, 0.0  ;;  %v3233_v44 = vld [vmem:[#allocation10 + $0x10] sm:$0xff]  }
 0x2b5   :  { %v1014_v38 = vadd.f32 %v2601_v24, %v1013_v37  ;;  %v1037_v34 = vmax.f32 %v1011_v58, 0.0  ;;  %2914 = vmatpush3.bf16.msra.mxu1 %v3232_v33  ;;  %v3235_v37 = vld [vmem:[#allocation10 + $0x20] sm:$0xff]  }
 0x2b6   :  { %v1040_v30 = vmax.f32 %v1022_v22, 0.0  ;;  %2915 = vmatprep.subr.bf16.mxu1 %v3233_v44 }
 0x2b7   :  { %v1038_v9 = vmax.f32 %v1014_v38, 0.0 }
 0x2b8   :  { %v1048_v25 = vpack.c.bf16 %v1040_v30, %v1039_v49  ;;  %v3236_v49 = vld [vmem:[#allocation10 + $0x28] sm:$0xff]  }
 0x2b9   :  { %v1047_v54 = vpack.c.bf16 %v1038_v9, %v1037_v34  ;;  %2916 = vmatpush3.bf16.msra.mxu1 %v3233_v44 }
 0x2ba   :  { %2917 = vmatprep.subr.bf16.mxu1 %v3234_v6 }
 0x2bb   :  { %2875 = vmatprep.mubr.bf16.mxu1 %v1047_v54 }
 0x2bc   :  { %2876 = vmatmul.mubr.bf16.gmra.mrb[60].mxu1 %v1048_v25 }
 0x2bd   :  { %2918 = vmatpush3.bf16.msra.mxu1 %v3234_v6 }
 0x2be   :  { %2919 = vmatprep.subr.bf16.mxu1 %v3235_v37 }
 0x2c1   :  { %2920 = vmatpush3.bf16.msra.mxu1 %v3235_v37 }
 0x2c2   :  { %2921 = vmatprep.subr.bf16.mxu1 %v3236_v49 }
 0x2c5   :  { %2922 = vmatpush3.bf16.msra.mxu1 %v3236_v49 }
 0x2c6   :  { %v3954_v39 = vpop.f32.mrb[32].mxu0 }
 0x2c7   :  { %v3956_v15 = vpop.f32.mrb[33].mxu0 }
 0x2c8   :  { %4234 = vst [vmem:[#allocation38_spill] sm:$0xff] %v3956_v15  ;;  %v3958_v7 = vpop.f32.mrb[34].mxu0 }
 0x2c9   :  { %v3960_v29 = vpop.f32.mrb[35].mxu0 }
 0x2ca   :  { %4235 = vst [vmem:[#allocation39_spill] sm:$0xff] %v3960_v29 }
 0x2ce   :  { %v3962_v24 = vpop.f32.mrb[36].mxu0 }
 0x2cf   :  { %v3964_v60 = vpop.f32.mrb[37].mxu0 }
 0x2d0   :  { %4236 = vst [vmem:[#allocation40_spill] sm:$0xff] %v3964_v60  ;;  %v3966_v55 = vpop.f32.mrb[38].mxu0 }
 0x2d1   :  { %v3968_v36 = vpop.f32.mrb[39].mxu0 }
 0x2d2   :  { %4237 = vst [vmem:[#allocation41_spill] sm:$0xff] %v3968_v36 }
 0x2d6   :  { %v3970_v58 = vpop.f32.mrb[40].mxu0 }
 0x2d7   :  { %v3972_v13 = vpop.f32.mrb[41].mxu0 }
 0x2d8   :  { %4238 = vst [vmem:[#allocation42_spill] sm:$0xff] %v3972_v13  ;;  %v3974_v22 = vpop.f32.mrb[42].mxu0 }
 0x2d9   :  { %v3976_v38 = vpop.f32.mrb[43].mxu0 }
 0x2da   :  { %4239 = vst [vmem:[#allocation43_spill] sm:$0xff] %v3976_v38 }
 0x2de   :  { %v3978_v30 = vpop.f32.mrb[44].mxu0 }
 0x2df   :  { %v3980_v34 = vpop.f32.mrb[45].mxu0 }
 0x2e0   :  { %4240 = vst [vmem:[#allocation44_spill] sm:$0xff] %v3980_v34  ;;  %v3982_v9 = vpop.f32.mrb[46].mxu0 }
 0x2e1   :  { %v3984_v25 = vpop.f32.mrb[47].mxu0 }
 0x2e2   :  { %4241 = vst [vmem:[#allocation45_spill] sm:$0xff] %v3984_v25 }
 0x2e6   :  { %v3986_v54 = vpop.f32.mrb[48].mxu0 }
 0x2e7   :  { %4242 = vst [vmem:[#allocation46_spill] sm:$0xff] %v3986_v54  ;;  %v3988_v40 = vpop.f32.mrb[49].mxu0 }
 0x2e8   :  { %4243 = vst [vmem:[#allocation47_spill] sm:$0xff] %v3988_v40  ;;  %v3990_v33 = vpop.f32.mrb[50].mxu0 }
 0x2e9   :  { %4244 = vst [vmem:[#allocation48_spill] sm:$0xff] %v3990_v33  ;;  %v3992_v44 = vpop.f32.mrb[51].mxu0 }
 0x2ea   :  { %4245 = vst [vmem:[#allocation49_spill] sm:$0xff] %v3992_v44 }
 0x2ee   :  { %v3994_v6 = vpop.f32.mrb[52].mxu0 }
 0x2ef   :  { %v3996_v38 = vpop.f32.mrb[53].mxu0 }
 0x2f0   :  { %4246 = vst [vmem:[#allocation50_spill] sm:$0xff] %v3996_v38  ;;  %v3998_v13 = vpop.f32.mrb[54].mxu0 }
 0x2f1   :  { %4247 = vst [vmem:[#allocation51_spill] sm:$0xff] %v3998_v13  ;;  %v4000_v37 = vpop.f32.mrb[55].mxu0 }
 0x2f2   :  { %4248 = vst [vmem:[#allocation52_spill] sm:$0xff] %v4000_v37 }
 0x2f6   :  { %v4002_v34 = vpop.f32.mrb[56].mxu0 }
 0x2f7   :  { %4249 = vst [vmem:[#allocation53_spill] sm:$0xff] %v4002_v34  ;;  %v4004_v25 = vpop.f32.mrb[57].mxu0 }
 0x2f8   :  { %4250 = vst [vmem:[#allocation54_spill] sm:$0xff] %v4004_v25  ;;  %v4006_v49 = vpop.f32.mrb[58].mxu0 }
 0x2f9   :  { %4251 = vst [vmem:[#allocation55_spill] sm:$0xff] %v4006_v49  ;;  %v4008_v29 = vpop.f32.mrb[59].mxu0 }
 0x2fa   :  { %4252 = vst [vmem:[#allocation56_spill] sm:$0xff] %v4008_v29 }
 0x2fe   :  { %v4010_v40 = vpop.f32.mrb[60].mxu0 }
 0x2ff   :  { %4253 = vst [vmem:[#allocation57_spill] sm:$0xff] %v4010_v40  ;;  %v4012_v36 = vpop.f32.mrb[61].mxu0 }
 0x300   :  { %4254 = vst [vmem:[#allocation58_spill] sm:$0xff] %v4012_v36  ;;  %v4014_v44 = vpop.f32.mrb[62].mxu0 }
 0x301   :  { %4255 = vst [vmem:[#allocation59_spill] sm:$0xff] %v4014_v44  ;;  %v4016_v15 = vpop.f32.mrb[63].mxu0 }
 0x302   :  { %4256 = vst [vmem:[#allocation60_spill] sm:$0xff] %v4016_v15 }
 0x377   :  { %v2865_v38 = vpop.f32.mrb[48].mxu1 }
 0x378   :  { %v1212_v60 = vadd.f32 %v2865_v38, %v3822_v48  ;;  %v1147_v37 = vpop.f32.mrb[49].mxu1 }
 0x379   :  { %v1210_v34 = vadd.f32 %v1147_v37, %v3818_v43  ;;  %v2866_v33 = vpop.f32.mrb[50].mxu1 }
 0x37a   :  { %v1213_v25 = vadd.f32 %v2866_v33, %v3824_v51  ;;  %v1150_v49 = vpop.f32.mrb[51].mxu1 }
 0x37b   :  { %v1211_v29 = vadd.f32 %v1150_v49, %v3820_v46 }
 0x37c   :  { %v1227_v13 = vpack.c.bf16 %v1213_v25, %v1212_v60 }
 0x37d   :  { %v1226_v40 = vpack.c.bf16 %v1211_v29, %v1210_v34 }
 0x37f   :  { %v2869_v54 = vpop.f32.mrb[52].mxu1  ;;  %2879 = vmatprep.subr.bf16.mxu0 %v1226_v40 }
 0x380   :  { %v1216_v36 = vadd.f32 %v2869_v54, %v3838_v62  ;;  %v1163_v44 = vpop.f32.mrb[53].mxu1  ;;  %2880 = vmatpush3.bf16.msra.mxu0 %v1226_v40 }
 0x381   :  { %v1214_v15 = vadd.f32 %v1163_v44, %v3826_v53  ;;  %v2870_v48 = vpop.f32.mrb[54].mxu1  ;;  %2881 = vmatprep.subr.bf16.mxu0 %v1227_v13 }
 0x382   :  { %v1217_v43 = vadd.f32 %v2870_v48, %v3840_v2  ;;  %v1166_v38 = vpop.f32.mrb[55].mxu1 }
 0x383   :  { %v1215_v51 = vadd.f32 %v1166_v38, %v3828_v56 }
 0x384   :  { %v1229_v33 = vpack.c.bf16 %v1217_v43, %v1216_v36  ;;  %2882 = vmatpush3.bf16.msra.mxu0 %v1227_v13 }
 0x385   :  { %v1228_v46 = vpack.c.bf16 %v1215_v51, %v1214_v15 }
 0x387   :  { %v2873_v60 = vpop.f32.mrb[56].mxu1  ;;  %2883 = vmatprep.subr.bf16.mxu0 %v1228_v46 }
 0x388   :  { %v1220_v29 = vadd.f32 %v2873_v60, %v3862_v17  ;;  %v1179_v34 = vpop.f32.mrb[57].mxu1  ;;  %2884 = vmatpush3.bf16.msra.mxu0 %v1228_v46 }
 0x389   :  { %v1218_v62 = vadd.f32 %v1179_v34, %v3850_v8  ;;  %v2874_v25 = vpop.f32.mrb[58].mxu1  ;;  %2885 = vmatprep.subr.bf16.mxu0 %v1229_v33 }
 0x38a   :  { %v1221_v53 = vadd.f32 %v2874_v25, %v3864_v20  ;;  %v1182_v54 = vpop.f32.mrb[59].mxu1 }
 0x38b   :  { %v1219_v2 = vadd.f32 %v1182_v54, %v3852_v11 }
 0x38c   :  { %v1231_v40 = vpack.c.bf16 %v1221_v53, %v1220_v29  ;;  %2886 = vmatpush3.bf16.msra.mxu0 %v1229_v33 }
 0x38d   :  { %v1230_v56 = vpack.c.bf16 %v1219_v2, %v1218_v62 }
 0x38f   :  { %v2877_v36 = vpop.f32.mrb[60].mxu1  ;;  %2887 = vmatprep.subr.bf16.mxu0 %v1230_v56 }
 0x390   :  { %v1224_v15 = vadd.f32 %v2877_v36, %v3886_v45  ;;  %v1195_v13 = vpop.f32.mrb[61].mxu1  ;;  %2888 = vmatpush3.bf16.msra.mxu0 %v1230_v56  ;;  %v2618_v45 = vld [vmem:[%s4210_s9] ss:$0 sm:$0xff] }
 0x391   :  { %v1222_v17 = vadd.f32 %v1195_v13, %v3874_v27  ;;  %v2878_v44 = vpop.f32.mrb[62].mxu1  ;;  %2889 = vmatprep.subr.bf16.mxu0 %v1231_v40  ;;  %v3237_v27 = vld [vmem:[#allocation10 + $0x30] sm:$0xff]  }
 0x392   :  { %v1225_v8 = vadd.f32 %v2878_v44, %v3888_v50  ;;  %v1198_v37 = vpop.f32.mrb[63].mxu1  ;;  %2923 = vmatprep.subr.bf16.mxu1 %v3237_v27 }
 0x393   :  { %v1223_v20 = vadd.f32 %v1198_v37, %v3876_v31  ;;  %2924 = vmatpush3.bf16.msra.mxu1 %v3237_v27  ;;  %v3238_v31 = vld [vmem:[#allocation10 + $0x38] sm:$0xff]  }
 0x394   :  { %v1233_v49 = vpack.c.bf16 %v1225_v8, %v1224_v15  ;;  %2890 = vmatpush3.bf16.msra.mxu0 %v1231_v40  ;;  %2925 = vmatprep.subr.bf16.mxu1 %v3238_v31 }
 0x395   :  { %v1232_v11 = vpack.c.bf16 %v1223_v20, %v1222_v17 }
 0x397   :  { %2891 = vmatprep.subr.bf16.mxu0 %v1232_v11  ;;  %2926 = vmatpush3.bf16.msra.mxu1 %v3238_v31 }
 0x398   :  { %2892 = vmatpush3.bf16.msra.mxu0 %v1232_v11 }
 0x399   :  { %2893 = vmatprep.subr.bf16.mxu0 %v1233_v49 }
 0x39c   :  { %2894 = vmatpush3.bf16.msra.mxu0 %v1233_v49 }
 0x39f   :  { %2896 = vmatmul.mubr.bf16.vlgmr.msra.gmra.mrb[64].mxu0 %v3894_v61 }
 0x3a0   :  { %2899 = vmatprep.mubr.bf16.mxu0 %v3898_v1 }
 0x3a7   :  { %2900 = vmatmul.mubr.bf16.gmra.mrb[68].mxu0 %v3908_v19 }
 0x3a8   :  { %2903 = vmatprep.mubr.bf16.mxu0 %v3912_v28 }
 0x3af   :  { %2904 = vmatmul.mubr.bf16.gmra.mrb[72].mxu0 %v3922_v0 }
 0x3b0   :  { %2907 = vmatprep.mubr.bf16.mxu0 %v3926_v42 }
 0x3b7   :  { %2908 = vmatmul.mubr.bf16.gmra.mrb[76].mxu0 %v3932_v16 }
 0x3b8   :  { %2959 = vmatprep.mubr.bf16.mxu0 %v3815_v41 }
 0x472   :  { %v2897_v50 = vpop.f32.mrb[64].mxu0 }
 0x473   :  { %v1284_v48 = vadd.f32 %v2897_v50, %v2618_v45  ;;  %v1275_v43 = vpop.f32.mrb[65].mxu0 }
 0x474   :  { %v1276_v38 = vadd.f32 %v2618_v45, %v1275_v43  ;;  %v2898_v51 = vpop.f32.mrb[66].mxu0 }
 0x475   :  { %v1287_v33 = vadd.f32 %v2898_v51, %v2618_v45  ;;  %v1278_v46 = vpop.f32.mrb[67].mxu0  ;;  %v1340_v29 = vmax.f32 %v1284_v48, 0.0 }
 0x476   :  { %v1279_v60 = vadd.f32 %v2618_v45, %v1278_v46  ;;  %v1338_v62 = vmax.f32 %v1276_v38, 0.0 }
 0x477   :  { %v1341_v34 = vmax.f32 %v1287_v33, 0.0 }
 0x478   :  { %v1339_v25 = vmax.f32 %v1279_v60, 0.0 }
 0x479   :  { %v1355_v53 = vpack.c.bf16 %v1341_v34, %v1340_v29 }
 0x47a   :  { %v1354_v54 = vpack.c.bf16 %v1339_v25, %v1338_v62  ;;  %v2901_v2 = vpop.f32.mrb[68].mxu0 }
 0x47b   :  { %v1300_v40 = vadd.f32 %v2901_v2, %v2618_v45  ;;  %v1291_v56 = vpop.f32.mrb[69].mxu0 }
 0x47c   :  { %v1292_v36 = vadd.f32 %v2618_v45, %v1291_v56  ;;  %v2902_v15 = vpop.f32.mrb[70].mxu0  ;;  %2927 = vmatprep.mubr.bf16.mxu1 %v1354_v54 }
 0x47d   :  { %v1303_v13 = vadd.f32 %v2902_v15, %v2618_v45  ;;  %v1294_v17 = vpop.f32.mrb[71].mxu0  ;;  %2928 = vmatmul.mubr.bf16.vlgmr.msra.gmra.mrb[64].mxu1 %v1355_v53  ;;  %v1344_v8 = vmax.f32 %v1300_v40, 0.0 }
 0x47e   :  { %v1295_v44 = vadd.f32 %v2618_v45, %v1294_v17  ;;  %v1342_v20 = vmax.f32 %v1292_v36, 0.0 }
 0x47f   :  { %v1345_v37 = vmax.f32 %v1303_v13, 0.0 }
 0x480   :  { %v1343_v49 = vmax.f32 %v1295_v44, 0.0 }
 0x481   :  { %v1357_v11 = vpack.c.bf16 %v1345_v37, %v1344_v8 }
 0x482   :  { %v1356_v27 = vpack.c.bf16 %v1343_v49, %v1342_v20  ;;  %v2905_v31 = vpop.f32.mrb[72].mxu0 }
 0x483   :  { %v1316_v50 = vadd.f32 %v2905_v31, %v2618_v45  ;;  %v1307_v48 = vpop.f32.mrb[73].mxu0  ;;  %v3240_v31 = vld [vmem:[#allocation11 + $0x8] sm:$0xff]  }
 0x484   :  { %v1308_v43 = vadd.f32 %v2618_v45, %v1307_v48  ;;  %v2906_v38 = vpop.f32.mrb[74].mxu0  ;;  %2931 = vmatprep.mubr.bf16.mxu1 %v1356_v27  ;;  %v3239_v27 = vld [vmem:[#allocation11] sm:$0xff]   ;;  %v3242_v48 = vld [vmem:[#allocation11 + $0x18] sm:$0xff]  }
 0x485   :  { %v1319_v51 = vadd.f32 %v2906_v38, %v2618_v45  ;;  %v1310_v33 = vpop.f32.mrb[75].mxu0  ;;  %2932 = vmatmul.mubr.bf16.gmra.mrb[68].mxu1 %v1357_v11  ;;  %v1348_v60 = vmax.f32 %v1316_v50, 0.0  ;;  %2975 = vmatprep.subr.bf16.mxu1 %v3239_v27  ;;  %v3241_v50 = vld [vmem:[#allocation11 + $0x10] sm:$0xff]  }
 0x486   :  { %v1311_v46 = vadd.f32 %v2618_v45, %v1310_v33  ;;  %v1346_v34 = vmax.f32 %v1308_v43, 0.0  ;;  %2976 = vmatpush3.bf16.msra.mxu1 %v3239_v27  ;;  %v3244_v43 = vld [vmem:[#allocation11 + $0x28] sm:$0xff]  }
 0x487   :  { %v1349_v29 = vmax.f32 %v1319_v51, 0.0  ;;  %2977 = vmatprep.subr.bf16.mxu1 %v3240_v31 }
 0x488   :  { %v1347_v62 = vmax.f32 %v1311_v46, 0.0 }
 0x489   :  { %v1359_v25 = vpack.c.bf16 %v1349_v29, %v1348_v60 }
 0x48a   :  { %v1358_v53 = vpack.c.bf16 %v1347_v62, %v1346_v34  ;;  %v2909_v54 = vpop.f32.mrb[76].mxu0  ;;  %2978 = vmatpush3.bf16.msra.mxu1 %v3240_v31 }
 0x48b   :  { %v1332_v2 = vadd.f32 %v2909_v54, %v2618_v45  ;;  %v1323_v40 = vpop.f32.mrb[77].mxu0  ;;  %2979 = vmatprep.subr.bf16.mxu1 %v3241_v50 }
 0x48c   :  { %v1324_v56 = vadd.f32 %v2618_v45, %v1323_v40  ;;  %v2910_v36 = vpop.f32.mrb[78].mxu0  ;;  %2935 = vmatprep.mubr.bf16.mxu1 %v1358_v53 }
 0x48d   :  { %v1335_v15 = vadd.f32 %v2910_v36, %v2618_v45  ;;  %v1326_v13 = vpop.f32.mrb[79].mxu0  ;;  %2936 = vmatmul.mubr.bf16.gmra.mrb[72].mxu1 %v1359_v25  ;;  %v1352_v44 = vmax.f32 %v1332_v2, 0.0 }
 0x48e   :  { %v1327_v17 = vadd.f32 %v2618_v45, %v1326_v13  ;;  %v1350_v37 = vmax.f32 %v1324_v56, 0.0  ;;  %2980 = vmatpush3.bf16.msra.mxu1 %v3241_v50  ;;  %v3243_v45 = vld [vmem:[#allocation11 + $0x20] sm:$0xff]  }
 0x48f   :  { %v1353_v8 = vmax.f32 %v1335_v15, 0.0  ;;  %2981 = vmatprep.subr.bf16.mxu1 %v3242_v48 }
 0x490   :  { %v1351_v20 = vmax.f32 %v1327_v17, 0.0 }
 0x491   :  { %v1361_v49 = vpack.c.bf16 %v1353_v8, %v1352_v44 }
 0x492   :  { %v1360_v11 = vpack.c.bf16 %v1351_v20, %v1350_v37  ;;  %2982 = vmatpush3.bf16.msra.mxu1 %v3242_v48 }
 0x493   :  { %2983 = vmatprep.subr.bf16.mxu1 %v3243_v45 }
 0x494   :  { %2939 = vmatprep.mubr.bf16.mxu1 %v1360_v11 }
 0x495   :  { %2940 = vmatmul.mubr.bf16.gmra.mrb[76].mxu1 %v1361_v49 }
 0x496   :  { %2984 = vmatpush3.bf16.msra.mxu1 %v3243_v45 }
 0x497   :  { %2985 = vmatprep.subr.bf16.mxu1 %v3244_v43 }
 0x49a   :  { %2986 = vmatpush3.bf16.msra.mxu1 %v3244_v43 }
 0x550   :  { %v2929_v38 = vpop.f32.mrb[64].mxu1 }
 0x551   :  { %v1525_v51 = vadd.f32 %v2929_v38, %v3842_v3  ;;  %v1460_v33 = vpop.f32.mrb[65].mxu1 }
 0x552   :  { %v1523_v46 = vadd.f32 %v1460_v33, %v3830_v57  ;;  %v2930_v60 = vpop.f32.mrb[66].mxu1 }
 0x553   :  { %v1526_v29 = vadd.f32 %v2930_v60, %v3846_v5  ;;  %v1463_v34 = vpop.f32.mrb[67].mxu1 }
 0x554   :  { %v1524_v62 = vadd.f32 %v1463_v34, %v3834_v59 }
 0x555   :  { %v1540_v25 = vpack.c.bf16 %v1526_v29, %v1525_v51 }
 0x556   :  { %v1539_v53 = vpack.c.bf16 %v1524_v62, %v1523_v46 }
 0x558   :  { %v2933_v54 = vpop.f32.mrb[68].mxu1  ;;  %2943 = vmatprep.subr.bf16.mxu0 %v1539_v53 }
 0x559   :  { %v1529_v2 = vadd.f32 %v2933_v54, %v3866_v21  ;;  %v1476_v40 = vpop.f32.mrb[69].mxu1  ;;  %2944 = vmatpush3.bf16.msra.mxu0 %v1539_v53 }
 0x55a   :  { %v1527_v56 = vadd.f32 %v1476_v40, %v3854_v12  ;;  %v2934_v3 = vpop.f32.mrb[70].mxu1  ;;  %2945 = vmatprep.subr.bf16.mxu0 %v1540_v25 }
 0x55b   :  { %v1530_v57 = vadd.f32 %v2934_v3, %v3870_v23  ;;  %v1479_v36 = vpop.f32.mrb[71].mxu1 }
 0x55c   :  { %v1528_v5 = vadd.f32 %v1479_v36, %v3858_v14 }
 0x55d   :  { %v1542_v15 = vpack.c.bf16 %v1530_v57, %v1529_v2  ;;  %2946 = vmatpush3.bf16.msra.mxu0 %v1540_v25 }
 0x55e   :  { %v1541_v59 = vpack.c.bf16 %v1528_v5, %v1527_v56 }
 0x560   :  { %v2937_v13 = vpop.f32.mrb[72].mxu1  ;;  %2947 = vmatprep.subr.bf16.mxu0 %v1541_v59 }
 0x561   :  { %v1533_v17 = vadd.f32 %v2937_v13, %v3890_v52  ;;  %v1492_v44 = vpop.f32.mrb[73].mxu1  ;;  %2948 = vmatpush3.bf16.msra.mxu0 %v1541_v59 }
 0x562   :  { %v1531_v21 = vadd.f32 %v1492_v44, %v3878_v32  ;;  %v2938_v8 = vpop.f32.mrb[74].mxu1  ;;  %2949 = vmatprep.subr.bf16.mxu0 %v1542_v15 }
 0x563   :  { %v1534_v12 = vadd.f32 %v2938_v8, %v3896_v63  ;;  %v1495_v37 = vpop.f32.mrb[75].mxu1 }
 0x564   :  { %v1532_v23 = vadd.f32 %v1495_v37, %v3882_v35 }
 0x565   :  { %v1544_v20 = vpack.c.bf16 %v1534_v12, %v1533_v17  ;;  %2950 = vmatpush3.bf16.msra.mxu0 %v1542_v15 }
 0x566   :  { %v1543_v14 = vpack.c.bf16 %v1532_v23, %v1531_v21 }
 0x568   :  { %v2941_v49 = vpop.f32.mrb[76].mxu1  ;;  %2951 = vmatprep.subr.bf16.mxu0 %v1543_v14 }
 0x569   :  { %v1537_v11 = vadd.f32 %v2941_v49, %v3918_v47  ;;  %v1508_v27 = vpop.f32.mrb[77].mxu1  ;;  %2952 = vmatpush3.bf16.msra.mxu0 %v1543_v14 }
 0x56a   :  { %v1535_v52 = vadd.f32 %v1508_v27, %v3904_v10  ;;  %v2942_v31 = vpop.f32.mrb[78].mxu1  ;;  %2953 = vmatprep.subr.bf16.mxu0 %v1544_v20  ;;  %v3245_v10 = vld [vmem:[#allocation11 + $0x30] sm:$0xff]  }
 0x56b   :  { %v1538_v32 = vadd.f32 %v2942_v31, %v3924_v18  ;;  %v1511_v50 = vpop.f32.mrb[79].mxu1  ;;  %2987 = vmatprep.subr.bf16.mxu1 %v3245_v10  ;;  %v3246_v18 = vld [vmem:[#allocation11 + $0x38] sm:$0xff]  }
 0x56c   :  { %v1536_v63 = vadd.f32 %v1511_v50, %v3910_v26  ;;  %2988 = vmatpush3.bf16.msra.mxu1 %v3245_v10 }
 0x56d   :  { %v1546_v48 = vpack.c.bf16 %v1538_v32, %v1537_v11  ;;  %2954 = vmatpush3.bf16.msra.mxu0 %v1544_v20  ;;  %2989 = vmatprep.subr.bf16.mxu1 %v3246_v18 }
 0x56e   :  { %v1545_v35 = vpack.c.bf16 %v1536_v63, %v1535_v52 }
 0x570   :  { %2955 = vmatprep.subr.bf16.mxu0 %v1545_v35  ;;  %2990 = vmatpush3.bf16.msra.mxu1 %v3246_v18 }
 0x571   :  { %2956 = vmatpush3.bf16.msra.mxu0 %v1545_v35 }
 0x572   :  { %2957 = vmatprep.subr.bf16.mxu0 %v1546_v48 }
 0x575   :  { %2958 = vmatpush3.bf16.msra.mxu0 %v1546_v48 }
 0x578   :  { %2960 = vmatmul.mubr.bf16.vlgmr.msra.gmra.mrb[80].mxu0 %v3894_v61  ;;  %v2627_v61 = vld [vmem:[%s4211_s10] ss:$0 sm:$0xff] }
 0x579   :  { %2963 = vmatprep.mubr.bf16.mxu0 %v3898_v1 }
 0x580   :  { %2964 = vmatmul.mubr.bf16.gmra.mrb[84].mxu0 %v3908_v19 }
 0x581   :  { %2967 = vmatprep.mubr.bf16.mxu0 %v3912_v28 }
 0x588   :  { %2968 = vmatmul.mubr.bf16.gmra.mrb[88].mxu0 %v3922_v0 }
 0x589   :  { %2971 = vmatprep.mubr.bf16.mxu0 %v3926_v42 }
 0x590   :  { %2972 = vmatmul.mubr.bf16.gmra.mrb[92].mxu0 %v3932_v16 }
 0x591   :  { %3023 = vmatprep.mubr.bf16.mxu0 %v3815_v41 }
 0x64b   :  { %v2961_v1 = vpop.f32.mrb[80].mxu0 }
 0x64c   :  { %v1597_v19 = vadd.f32 %v2961_v1, %v2627_v61  ;;  %v1588_v26 = vpop.f32.mrb[81].mxu0 }
 0x64d   :  { %v1589_v0 = vadd.f32 %v2627_v61, %v1588_v26  ;;  %v2962_v28 = vpop.f32.mrb[82].mxu0 }
 0x64e   :  { %v1600_v42 = vadd.f32 %v2962_v28, %v2627_v61  ;;  %v1591_v47 = vpop.f32.mrb[83].mxu0  ;;  %v1653_v45 = vmax.f32 %v1597_v19, 0.0  ;;  %v3248_v28 = vld [vmem:[#allocation13 + $0x8] sm:$0xff]  }
 0x64f   :  { %v1592_v16 = vadd.f32 %v2627_v61, %v1591_v47  ;;  %v1651_v43 = vmax.f32 %v1589_v0, 0.0  ;;  %v3247_v0 = vld [vmem:[#allocation13] sm:$0xff]   ;;  %v3250_v47 = vld [vmem:[#allocation13 + $0x18] sm:$0xff]  }
 0x650   :  { %v1654_v41 = vmax.f32 %v1600_v42, 0.0  ;;  %3039 = vmatprep.subr.bf16.mxu1 %v3247_v0  ;;  %v3249_v42 = vld [vmem:[#allocation13 + $0x10] sm:$0xff]  }
 0x651   :  { %v1652_v38 = vmax.f32 %v1592_v16, 0.0  ;;  %v3252_v16 = vld [vmem:[#allocation13 + $0x28] sm:$0xff]  }
 0x652   :  { %v1668_v51 = vpack.c.bf16 %v1654_v41, %v1653_v45 }
 0x653   :  { %v1667_v33 = vpack.c.bf16 %v1652_v38, %v1651_v43  ;;  %v2965_v46 = vpop.f32.mrb[84].mxu0  ;;  %v4257_v38 = vld [vmem:[#allocation23_spill] sm:$0xff] }
 0x654   :  { %v1613_v60 = vadd.f32 %v2965_v46, %v2627_v61  ;;  %v1604_v29 = vpop.f32.mrb[85].mxu0  ;;  %v4258_v46 = vld [vmem:[#allocation25_spill] sm:$0xff] }
 0x655   :  { %v1605_v34 = vadd.f32 %v2627_v61, %v1604_v29  ;;  %v2966_v62 = vpop.f32.mrb[86].mxu0  ;;  %2991 = vmatprep.mubr.bf16.mxu1 %v1667_v33 }
 0x656   :  { %v1616_v25 = vadd.f32 %v2966_v62, %v2627_v61  ;;  %v1607_v53 = vpop.f32.mrb[87].mxu0  ;;  %2992 = vmatmul.mubr.bf16.vlgmr.msra.gmra.mrb[80].mxu1 %v1668_v51  ;;  %v1657_v2 = vmax.f32 %v1613_v60, 0.0 }
 0x657   :  { %v1608_v54 = vadd.f32 %v2627_v61, %v1607_v53  ;;  %v1655_v56 = vmax.f32 %v1605_v34, 0.0  ;;  %3040 = vmatpush3.bf16.msra.mxu1 %v3247_v0  ;;  %v4259_v34 = vld [vmem:[#allocation24_spill] sm:$0xff] }
 0x658   :  { %v1658_v40 = vmax.f32 %v1616_v25, 0.0  ;;  %3041 = vmatprep.subr.bf16.mxu1 %v3248_v28 }
 0x659   :  { %v1656_v3 = vmax.f32 %v1608_v54, 0.0 }
 0x65a   :  { %v1670_v57 = vpack.c.bf16 %v1658_v40, %v1657_v2  ;;  %v4260_v2 = vld [vmem:[#allocation28_spill] sm:$0xff] }
 0x65b   :  { %v1669_v36 = vpack.c.bf16 %v1656_v3, %v1655_v56  ;;  %v2969_v5 = vpop.f32.mrb[88].mxu0  ;;  %3042 = vmatpush3.bf16.msra.mxu1 %v3248_v28  ;;  %v4261_v3 = vld [vmem:[#allocation26_spill] sm:$0xff] }
 0x65c   :  { %v1629_v15 = vadd.f32 %v2969_v5, %v2627_v61  ;;  %v1620_v59 = vpop.f32.mrb[89].mxu0  ;;  %3043 = vmatprep.subr.bf16.mxu1 %v3249_v42 }
 0x65d   :  { %v1621_v13 = vadd.f32 %v2627_v61, %v1620_v59  ;;  %v2970_v17 = vpop.f32.mrb[90].mxu0  ;;  %2995 = vmatprep.mubr.bf16.mxu1 %v1669_v36  ;;  %v4262_v36 = vld [vmem:[#allocation29_spill] sm:$0xff]  ;;  %v4263_v59 = vld [vmem:[#allocation27_spill] sm:$0xff] }
 0x65e   :  { %v1632_v44 = vadd.f32 %v2970_v17, %v2627_v61  ;;  %v1623_v21 = vpop.f32.mrb[91].mxu0  ;;  %2996 = vmatmul.mubr.bf16.gmra.mrb[84].mxu1 %v1670_v57  ;;  %v1661_v12 = vmax.f32 %v1629_v15, 0.0 }
 0x65f   :  { %v1624_v8 = vadd.f32 %v2627_v61, %v1623_v21  ;;  %v1659_v23 = vmax.f32 %v1621_v13, 0.0  ;;  %3044 = vmatpush3.bf16.msra.mxu1 %v3249_v42  ;;  %v4271_v42 = vld [vmem:[#allocation35_spill] sm:$0xff] }
 0x660   :  { %v1662_v37 = vmax.f32 %v1632_v44, 0.0  ;;  %3045 = vmatprep.subr.bf16.mxu1 %v3250_v47 }
 0x661   :  { %v1660_v20 = vmax.f32 %v1624_v8, 0.0  ;;  %v4264_v8 = vld [vmem:[#allocation32_spill] sm:$0xff] }
 0x662   :  { %v1672_v14 = vpack.c.bf16 %v1662_v37, %v1661_v12 }
 0x663   :  { %v1671_v49 = vpack.c.bf16 %v1660_v20, %v1659_v23  ;;  %v2973_v11 = vpop.f32.mrb[92].mxu0  ;;  %3046 = vmatpush3.bf16.msra.mxu1 %v3250_v47  ;;  %v4265_v23 = vld [vmem:[#allocation30_spill] sm:$0xff] }
 0x664   :  { %v1645_v27 = vadd.f32 %v2973_v11, %v2627_v61  ;;  %v1636_v52 = vpop.f32.mrb[93].mxu0 }
 0x665   :  { %v1637_v31 = vadd.f32 %v2627_v61, %v1636_v52  ;;  %v2974_v32 = vpop.f32.mrb[94].mxu0  ;;  %2999 = vmatprep.mubr.bf16.mxu1 %v1671_v49  ;;  %v4266_v49 = vld [vmem:[#allocation33_spill] sm:$0xff]  ;;  %v4267_v52 = vld [vmem:[#allocation31_spill] sm:$0xff] }
 0x666   :  { %v1648_v50 = vadd.f32 %v2974_v32, %v2627_v61  ;;  %v1639_v63 = vpop.f32.mrb[95].mxu0  ;;  %3000 = vmatmul.mubr.bf16.gmra.mrb[88].mxu1 %v1672_v14  ;;  %v1665_v35 = vmax.f32 %v1645_v27, 0.0 }
 0x667   :  { %v1640_v48 = vadd.f32 %v2627_v61, %v1639_v63  ;;  %v1663_v18 = vmax.f32 %v1637_v31, 0.0  ;;  %v3251_v61 = vld [vmem:[#allocation13 + $0x20] sm:$0xff]  }
 0x668   :  { %v1666_v10 = vmax.f32 %v1648_v50, 0.0  ;;  %3047 = vmatprep.subr.bf16.mxu1 %v3251_v61 }
 0x669   :  { %v1664_v1 = vmax.f32 %v1640_v48, 0.0  ;;  %3048 = vmatpush3.bf16.msra.mxu1 %v3251_v61  ;;  %v4268_v48 = vld [vmem:[#allocation36_spill] sm:$0xff] }
 0x66a   :  { %v1674_v19 = vpack.c.bf16 %v1666_v10, %v1665_v35  ;;  %3049 = vmatprep.subr.bf16.mxu1 %v3252_v16 }
 0x66b   :  { %v1673_v26 = vpack.c.bf16 %v1664_v1, %v1663_v18  ;;  %v4269_v18 = vld [vmem:[#allocation34_spill] sm:$0xff] }
 0x66d   :  { %3003 = vmatprep.mubr.bf16.mxu1 %v1673_v26  ;;  %3050 = vmatpush3.bf16.msra.mxu1 %v3252_v16  ;;  %v4270_v26 = vld [vmem:[#allocation37_spill] sm:$0xff] }
 0x66e   :  { %3004 = vmatmul.mubr.bf16.gmra.mrb[92].mxu1 %v1674_v19 }
 0x729   :  { %v2993_v45 = vpop.f32.mrb[80].mxu1 }
 0x72a   :  { %v1838_v41 = vadd.f32 %v2993_v45, %v3844_v4  ;;  %v1773_v43 = vpop.f32.mrb[81].mxu1  ;;  %v3327_v45 = vld [vmem:[#allocation2 + $0x8] sm:$0xff]  }
 0x72b   :  { %v1836_v51 = vadd.f32 %v1773_v43, %v4257_v38  ;;  %v2994_v33 = vpop.f32.mrb[82].mxu1  ;;  %v3329_v43 = vld [vmem:[#allocation2 + $0x18] sm:$0xff]   ;;  %v3330_v38 = vld [vmem:[#allocation2 + $0x20] sm:$0xff]  }
 0x72c   :  { %v1839_v60 = vadd.f32 %v2994_v33, %v4258_v46  ;;  %v1776_v29 = vpop.f32.mrb[83].mxu1  ;;  %v3332_v33 = vld [vmem:[#allocation2 + $0x30] sm:$0xff]   ;;  %v3333_v46 = vld [vmem:[#allocation2 + $0x38] sm:$0xff]  }
 0x72d   :  { %v1837_v62 = vadd.f32 %v1776_v29, %v4259_v34  ;;  %v3254_v29 = vld [vmem:[#allocation13 + $0x38] sm:$0xff]   ;;  %v3255_v34 = vld [vmem:[#allocation14] sm:$0xff]  }
 0x72e   :  { %v1853_v25 = vpack.c.bf16 %v1839_v60, %v1838_v41  ;;  %v3328_v41 = vld [vmem:[#allocation2 + $0x10] sm:$0xff]  }
 0x72f   :  { %v1852_v53 = vpack.c.bf16 %v1837_v62, %v1836_v51  ;;  %v3331_v51 = vld [vmem:[#allocation2 + $0x28] sm:$0xff]   ;;  %v3253_v60 = vld [vmem:[#allocation13 + $0x30] sm:$0xff]  }
 0x730   :  { %3051 = vmatprep.subr.bf16.mxu1 %v3253_v60  ;;  %v3256_v62 = vld [vmem:[#allocation14 + $0x8] sm:$0xff]  }
 0x731   :  { %v2997_v54 = vpop.f32.mrb[84].mxu1  ;;  %3007 = vmatprep.subr.bf16.mxu0 %v1852_v53  ;;  %3052 = vmatpush3.bf16.msra.mxu1 %v3253_v60 }
 0x732   :  { %v1842_v40 = vadd.f32 %v2997_v54, %v4260_v2  ;;  %v1789_v56 = vpop.f32.mrb[85].mxu1  ;;  %3008 = vmatpush3.bf16.msra.mxu0 %v1852_v53  ;;  %3053 = vmatprep.subr.bf16.mxu1 %v3254_v29  ;;  %v3258_v53 = vld [vmem:[#allocation14 + $0x18] sm:$0xff]   ;;  %v4088_v54 = vld [vmem:[#allocation14 + $0x20] sm:$0xff]  }
 0x733   :  { %v1840_v57 = vadd.f32 %v1789_v56, %v4261_v3  ;;  %v2998_v4 = vpop.f32.mrb[86].mxu1  ;;  %3009 = vmatprep.subr.bf16.mxu0 %v1853_v25  ;;  %v4095_v2 = vld [vmem:[%s4212_s11] ss:$0 sm:$0xff] }
 0x734   :  { %v1843_v5 = vadd.f32 %v2998_v4, %v4262_v36  ;;  %v1792_v15 = vpop.f32.mrb[87].mxu1 }
 0x735   :  { %v1841_v13 = vadd.f32 %v1792_v15, %v4263_v59  ;;  %3054 = vmatpush3.bf16.msra.mxu1 %v3254_v29 }
 0x736   :  { %v1855_v17 = vpack.c.bf16 %v1843_v5, %v1842_v40  ;;  %3010 = vmatpush3.bf16.msra.mxu0 %v1853_v25  ;;  %3103 = vmatprep.subr.bf16.mxu1 %v3255_v34  ;;  %v3257_v25 = vld [vmem:[#allocation14 + $0x10] sm:$0xff]  }
 0x737   :  { %v1854_v44 = vpack.c.bf16 %v1841_v13, %v1840_v57 }
 0x739   :  { %v3001_v21 = vpop.f32.mrb[88].mxu1  ;;  %3011 = vmatprep.subr.bf16.mxu0 %v1854_v44 }
 0x73a   :  { %v1846_v12 = vadd.f32 %v3001_v21, %v4264_v8  ;;  %v1805_v37 = vpop.f32.mrb[89].mxu1  ;;  %3012 = vmatpush3.bf16.msra.mxu0 %v1854_v44 }
 0x73b   :  { %v1844_v20 = vadd.f32 %v1805_v37, %v4265_v23  ;;  %v3002_v14 = vpop.f32.mrb[90].mxu1  ;;  %3013 = vmatprep.subr.bf16.mxu0 %v1855_v17 }
 0x73c   :  { %v1847_v11 = vadd.f32 %v3002_v14, %v4266_v49  ;;  %v1808_v27 = vpop.f32.mrb[91].mxu1 }
 0x73d   :  { %v1845_v31 = vadd.f32 %v1808_v27, %v4267_v52 }
 0x73e   :  { %v1857_v32 = vpack.c.bf16 %v1847_v11, %v1846_v12  ;;  %3014 = vmatpush3.bf16.msra.mxu0 %v1855_v17 }
 0x73f   :  { %v1856_v50 = vpack.c.bf16 %v1845_v31, %v1844_v20 }
 0x741   :  { %v3005_v63 = vpop.f32.mrb[92].mxu1  ;;  %3015 = vmatprep.subr.bf16.mxu0 %v1856_v50 }
 0x742   :  { %v1850_v35 = vadd.f32 %v3005_v63, %v4268_v48  ;;  %v1821_v10 = vpop.f32.mrb[93].mxu1  ;;  %3016 = vmatpush3.bf16.msra.mxu0 %v1856_v50 }
 0x743   :  { %v1848_v1 = vadd.f32 %v1821_v10, %v4269_v18  ;;  %v3006_v19 = vpop.f32.mrb[94].mxu1  ;;  %3017 = vmatprep.subr.bf16.mxu0 %v1857_v32 }
 0x744   :  { %v1851_v0 = vadd.f32 %v3006_v19, %v4270_v26  ;;  %v1824_v28 = vpop.f32.mrb[95].mxu1 }
 0x745   :  { %v1849_v47 = vadd.f32 %v1824_v28, %v4271_v42 }
 0x746   :  { %v1859_v61 = vpack.c.bf16 %v1851_v0, %v1850_v35  ;;  %3018 = vmatpush3.bf16.msra.mxu0 %v1857_v32 }
 0x747   :  { %v1858_v16 = vpack.c.bf16 %v1849_v47, %v1848_v1 }
 0x749   :  { %3019 = vmatprep.subr.bf16.mxu0 %v1858_v16 }
 0x74a   :  { %3020 = vmatpush3.bf16.msra.mxu0 %v1858_v16 }
 0x74b   :  { %3021 = vmatprep.subr.bf16.mxu0 %v1859_v61 }
 0x74e   :  { %3022 = vmatpush3.bf16.msra.mxu0 %v1859_v61 }
 0x74f   :  { %3071 = vmatprep.subr.bf16.mxu0 %v3255_v34 }
 0x751   :  { %3024 = vmatmul.mubr.bf16.vlgmr.msra.gmra.mrb[96].mxu0 %v3327_v45 }
 0x752   :  { %3027 = vmatprep.mubr.bf16.mxu0 %v3328_v41  ;;  %3072 = vmatpush3.bf16.msra.mxu0 %v3255_v34 }
 0x753   :  { %3073 = vmatprep.subr.bf16.mxu0 %v3256_v62 }
 0x756   :  { %3074 = vmatpush3.bf16.msra.mxu0 %v3256_v62 }
 0x757   :  { %3075 = vmatprep.subr.bf16.mxu0 %v3257_v25 }
 0x759   :  { %3028 = vmatmul.mubr.bf16.gmra.mrb[100].mxu0 %v3329_v43 }
 0x75a   :  { %3031 = vmatprep.mubr.bf16.mxu0 %v3330_v38  ;;  %3076 = vmatpush3.bf16.msra.mxu0 %v3257_v25 }
 0x75b   :  { %3077 = vmatprep.subr.bf16.mxu0 %v3258_v53 }
 0x75e   :  { %3078 = vmatpush3.bf16.msra.mxu0 %v3258_v53 }
 0x75f   :  { %3079 = vmatprep.subr.bf16.mxu0 %v4088_v54 }
 0x761   :  { %3032 = vmatmul.mubr.bf16.gmra.mrb[104].mxu0 %v3331_v51 }
 0x762   :  { %3035 = vmatprep.mubr.bf16.mxu0 %v3332_v33  ;;  %3080 = vmatpush3.bf16.msra.mxu0 %v4088_v54 }
 0x769   :  { %3036 = vmatmul.mubr.bf16.gmra.mrb[108].mxu0 %v3333_v46 }
 0x824   :  { %v3025_v40 = vpop.f32.mrb[96].mxu0 }
 0x825   :  { %v1910_v56 = vadd.f32 %v3025_v40, %v4095_v2  ;;  %v1901_v3 = vpop.f32.mrb[97].mxu0 }
 0x826   :  { %v1902_v57 = vadd.f32 %v4095_v2, %v1901_v3  ;;  %v3026_v4 = vpop.f32.mrb[98].mxu0 }
 0x827   :  { %v1913_v36 = vadd.f32 %v3026_v4, %v4095_v2  ;;  %v1904_v5 = vpop.f32.mrb[99].mxu0  ;;  %v1966_v59 = vmax.f32 %v1910_v56, 0.0  ;;  %v3261_v4 = vld [vmem:[#allocation14 + $0x30] sm:$0xff]  }
 0x828   :  { %v1905_v15 = vadd.f32 %v4095_v2, %v1904_v5  ;;  %v1964_v17 = vmax.f32 %v1902_v57, 0.0  ;;  %v3260_v57 = vld [vmem:[#allocation14 + $0x28] sm:$0xff]  }
 0x829   :  { %v1967_v13 = vmax.f32 %v1913_v36, 0.0  ;;  %3081 = vmatprep.subr.bf16.mxu0 %v3260_v57  ;;  %v4118_v36 = vld [vmem:[%s4213_s12] ss:$0 sm:$0xff] }
 0x82a   :  { %v1965_v44 = vmax.f32 %v1905_v15, 0.0  ;;  %3082 = vmatpush3.bf16.msra.mxu0 %v3260_v57 }
 0x82b   :  { %v1981_v21 = vpack.c.bf16 %v1967_v13, %v1966_v59  ;;  %3083 = vmatprep.subr.bf16.mxu0 %v3261_v4 }
 0x82c   :  { %v1980_v8 = vpack.c.bf16 %v1965_v44, %v1964_v17  ;;  %v3029_v12 = vpop.f32.mrb[100].mxu0 }
 0x82d   :  { %v1926_v37 = vadd.f32 %v3029_v12, %v4095_v2  ;;  %v1917_v23 = vpop.f32.mrb[101].mxu0 }
 0x82e   :  { %v1918_v20 = vadd.f32 %v4095_v2, %v1917_v23  ;;  %v3030_v14 = vpop.f32.mrb[102].mxu0  ;;  %3055 = vmatprep.mubr.bf16.mxu1 %v1980_v8  ;;  %3084 = vmatpush3.bf16.msra.mxu0 %v3261_v4 }
 0x82f   :  { %v1929_v49 = vadd.f32 %v3030_v14, %v4095_v2  ;;  %v1920_v11 = vpop.f32.mrb[103].mxu0  ;;  %3056 = vmatmul.mubr.bf16.vlgmr.msra.gmra.mrb[96].mxu1 %v1981_v21  ;;  %v1970_v52 = vmax.f32 %v1926_v37, 0.0 }
 0x830   :  { %v1921_v27 = vadd.f32 %v4095_v2, %v1920_v11  ;;  %3111 = vmatpush3.bf16.msra.mxu1 %v3255_v34  ;;  %v1968_v32 = vmax.f32 %v1918_v20, 0.0 }
 0x831   :  { %v1971_v31 = vmax.f32 %v1929_v49, 0.0  ;;  %3104 = vmatprep.subr.bf16.mxu1 %v3256_v62 }
 0x832   :  { %v1969_v50 = vmax.f32 %v1921_v27, 0.0 }
 0x833   :  { %v1983_v63 = vpack.c.bf16 %v1971_v31, %v1970_v52 }
 0x834   :  { %v1982_v48 = vpack.c.bf16 %v1969_v50, %v1968_v32  ;;  %v3033_v35 = vpop.f32.mrb[104].mxu0  ;;  %3112 = vmatpush3.bf16.msra.mxu1 %v3256_v62 }
 0x835   :  { %v1942_v10 = vadd.f32 %v3033_v35, %v4095_v2  ;;  %v1933_v18 = vpop.f32.mrb[105].mxu0  ;;  %3105 = vmatprep.subr.bf16.mxu1 %v3257_v25 }
 0x836   :  { %v1934_v1 = vadd.f32 %v4095_v2, %v1933_v18  ;;  %v3034_v19 = vpop.f32.mrb[106].mxu0  ;;  %3059 = vmatprep.mubr.bf16.mxu1 %v1982_v48 }
 0x837   :  { %v1945_v26 = vadd.f32 %v3034_v19, %v4095_v2  ;;  %v1936_v0 = vpop.f32.mrb[107].mxu0  ;;  %3060 = vmatmul.mubr.bf16.gmra.mrb[100].mxu1 %v1983_v63  ;;  %v1974_v42 = vmax.f32 %v1942_v10, 0.0 }
 0x838   :  { %v1937_v28 = vadd.f32 %v4095_v2, %v1936_v0  ;;  %3113 = vmatpush3.bf16.msra.mxu1 %v3257_v25  ;;  %v1972_v61 = vmax.f32 %v1934_v1, 0.0 }
 0x839   :  { %v1975_v47 = vmax.f32 %v1945_v26, 0.0  ;;  %3106 = vmatprep.subr.bf16.mxu1 %v3258_v53 }
 0x83a   :  { %v1973_v16 = vmax.f32 %v1937_v28, 0.0 }
 0x83b   :  { %v1985_v45 = vpack.c.bf16 %v1975_v47, %v1974_v42  ;;  %v4272_v42 = vld [vmem:[#allocation46_spill] sm:$0xff] }
 0x83c   :  { %v1984_v41 = vpack.c.bf16 %v1973_v16, %v1972_v61  ;;  %v3037_v43 = vpop.f32.mrb[108].mxu0  ;;  %3114 = vmatpush3.bf16.msra.mxu1 %v3258_v53 }
 0x83d   :  { %v1958_v38 = vadd.f32 %v3037_v43, %v4095_v2  ;;  %v1949_v51 = vpop.f32.mrb[109].mxu0  ;;  %3107 = vmatprep.subr.bf16.mxu1 %v4088_v54 }
 0x83e   :  { %v1950_v33 = vadd.f32 %v4095_v2, %v1949_v51  ;;  %v3038_v46 = vpop.f32.mrb[110].mxu0  ;;  %3063 = vmatprep.mubr.bf16.mxu1 %v1984_v41  ;;  %v4274_v51 = vld [vmem:[#allocation48_spill] sm:$0xff] }
 0x83f   :  { %v1961_v60 = vadd.f32 %v3038_v46, %v4095_v2  ;;  %v1952_v29 = vpop.f32.mrb[111].mxu0  ;;  %3064 = vmatmul.mubr.bf16.gmra.mrb[104].mxu1 %v1985_v45  ;;  %v1978_v62 = vmax.f32 %v1958_v38, 0.0  ;;  %v4273_v45 = vld [vmem:[#allocation51_spill] sm:$0xff] }
 0x840   :  { %v1953_v34 = vadd.f32 %v4095_v2, %v1952_v29  ;;  %3115 = vmatpush3.bf16.msra.mxu1 %v4088_v54  ;;  %v1976_v53 = vmax.f32 %v1950_v33, 0.0  ;;  %v3262_v2 = vld [vmem:[#allocation14 + $0x38] sm:$0xff]  }
 0x841   :  { %v1979_v25 = vmax.f32 %v1961_v60, 0.0  ;;  %3108 = vmatprep.subr.bf16.mxu1 %v3260_v57  ;;  %3085 = vmatprep.subr.bf16.mxu0 %v3262_v2 }
 0x842   :  { %v1977_v40 = vmax.f32 %v1953_v34, 0.0  ;;  %3086 = vmatpush3.bf16.msra.mxu0 %v3262_v2 }
 0x843   :  { %v1987_v56 = vpack.c.bf16 %v1979_v25, %v1978_v62 }
 0x844   :  { %v1986_v3 = vpack.c.bf16 %v1977_v40, %v1976_v53  ;;  %3116 = vmatpush3.bf16.msra.mxu1 %v3260_v57  ;;  %v4275_v40 = vld [vmem:[#allocation57_spill] sm:$0xff] }
 0x845   :  { %3109 = vmatprep.subr.bf16.mxu1 %v3261_v4  ;;  %v4276_v57 = vld [vmem:[#allocation53_spill] sm:$0xff] }
 0x846   :  { %3067 = vmatprep.mubr.bf16.mxu1 %v1986_v3 }
 0x847   :  { %3068 = vmatmul.mubr.bf16.gmra.mrb[108].mxu1 %v1987_v56 }
 0x848   :  { %3117 = vmatpush3.bf16.msra.mxu1 %v3261_v4 }
 0x849   :  { %3110 = vmatprep.subr.bf16.mxu1 %v3262_v2 }
 0x84c   :  { %3118 = vmatpush3.bf16.msra.mxu1 %v3262_v2 }
 0x902   :  { %v3057_v54 = vpop.f32.mrb[96].mxu1 }
 0x903   :  { %v2151_v5 = vadd.f32 %v3057_v54, %v3962_v24  ;;  %v2086_v15 = vpop.f32.mrb[97].mxu1 }
 0x904   :  { %v2149_v59 = vadd.f32 %v2086_v15, %v3954_v39  ;;  %v3058_v13 = vpop.f32.mrb[98].mxu1  ;;  %v4277_v15 = vld [vmem:[#allocation59_spill] sm:$0xff] }
 0x905   :  { %v2174_v17 = vadd.f32 %v4118_v36, %v2151_v5  ;;  %v2152_v44 = vadd.f32 %v3058_v13, %v3966_v55  ;;  %v2089_v21 = vpop.f32.mrb[99].mxu1 }
 0x906   :  { %v2172_v8 = vadd.f32 %v4118_v36, %v2149_v59  ;;  %v2150_v12 = vadd.f32 %v2089_v21, %v3958_v7 }
 0x907   :  { %v2175_v37 = vadd.f32 %v4118_v36, %v2152_v44  ;;  %v2190_v20 = vmax.f32 %v2174_v17, 0.0  ;;  %v4278_v44 = vld [vmem:[#allocation55_spill] sm:$0xff] }
 0x908   :  { %v2173_v23 = vadd.f32 %v4118_v36, %v2150_v12  ;;  %v2188_v24 = vmax.f32 %v2172_v8, 0.0 }
 0x909   :  { %v2191_v14 = vmax.f32 %v2175_v37, 0.0 }
 0x90a   :  { %v2189_v49 = vmax.f32 %v2173_v23, 0.0  ;;  %v3061_v11 = vpop.f32.mrb[100].mxu1 }
 0x90b   :  { %v2205_v39 = vpack.c.bf16 %v2191_v14, %v2190_v20  ;;  %v2155_v27 = vadd.f32 %v3061_v11, %v3978_v30  ;;  %v2102_v52 = vpop.f32.mrb[101].mxu1 }
 0x90c   :  { %v2153_v55 = vadd.f32 %v2102_v52, %v3970_v58  ;;  %v3062_v31 = vpop.f32.mrb[102].mxu1  ;;  %v2204_v32 = vpack.c.bf16 %v2189_v49, %v2188_v24 }
 0x90d   :  { %v2178_v50 = vadd.f32 %v4118_v36, %v2155_v27  ;;  %v2156_v7 = vadd.f32 %v3062_v31, %v3982_v9  ;;  %v2105_v63 = vpop.f32.mrb[103].mxu1  ;;  %v4279_v27 = vld [vmem:[#allocation40_spill] sm:$0xff]  ;;  %v4280_v31 = vld [vmem:[#allocation38_spill] sm:$0xff] }
 0x90e   :  { %v2176_v48 = vadd.f32 %v4118_v36, %v2153_v55  ;;  %v2154_v35 = vadd.f32 %v2105_v63, %v3974_v22  ;;  %3087 = vmatprep.mubr.bf16.mxu0 %v2204_v32 }
 0x90f   :  { %v2179_v10 = vadd.f32 %v4118_v36, %v2156_v7  ;;  %3088 = vmatmul.mubr.bf16.vlgmr.msra.gmra.mrb[112].mxu0 %v2205_v39  ;;  %v2194_v18 = vmax.f32 %v2178_v50, 0.0  ;;  %v4155_v39 = vld [vmem:[%s4214_s13] ss:$0 sm:$0xff]  ;;  %v4281_v7 = vld [vmem:[#allocation41_spill] sm:$0xff]  ;;  %s3557_s13 = smov [#allocation16]  }
 0x910   :  { %v2177_v30 = vadd.f32 %v4118_v36, %v2154_v35  ;;  %v2192_v58 = vmax.f32 %v2176_v48, 0.0  ;;  %s2529_s17 = sshll.u32 %s3557_s13, 4  ;;  %s2530_s17 = int_to_ptr.vmem [resolvable:$true] %s2529_s17 }
 0x911   :  { %v2195_v1 = vmax.f32 %v2179_v10, 0.0  ;;  %v4282_v10 = vld [vmem:[#allocation39_spill] sm:$0xff]  ;;  %s3510_s5 = scalar_lea.vmem %s2530_s17, 2048  ;;  %p3515_p9 = scmp.lt.s32.totalorder %s2530_s17, %s2530_s17 }
 0x912   :  { %v2193_v19 = vmax.f32 %v2177_v30, 0.0  ;;  %v3065_v26 = vpop.f32.mrb[104].mxu1  ;;  %p3511_p8 = scmp.ne.s32.totalorder %s2530_s17, %s3510_s5  ;;  %p3516_p10 = scmp.lt.s32.totalorder %s3510_s5, %s3510_s5 }
 0x913   :  { %v2159_v0 = vadd.f32 %v3065_v26, %v3994_v6  ;;  %v2118_v28 = vpop.f32.mrb[105].mxu1  ;;  %v2207_v9 = vpack.c.bf16 %v2195_v1, %v2194_v18 }
 0x914   :  { %v2157_v47 = vadd.f32 %v2118_v28, %v4272_v42  ;;  %v3066_v61 = vpop.f32.mrb[106].mxu1  ;;  %v2206_v16 = vpack.c.bf16 %v2193_v19, %v2192_v58  ;;  %p3517_p11 = por %p3516_p10, %p3515_p9 }
 0x915   :  { %v2182_v22 = vadd.f32 %v4118_v36, %v2159_v0  ;;  %v2160_v41 = vadd.f32 %v3066_v61, %v4273_v45  ;;  %v2121_v43 = vpop.f32.mrb[107].mxu1  ;;  %v4284_v61 = vld [vmem:[#allocation42_spill] sm:$0xff] }
 0x916   :  { %v2180_v38 = vadd.f32 %v4118_v36, %v2157_v47  ;;  %v2158_v33 = vadd.f32 %v2121_v43, %v4274_v51  ;;  %3091 = vmatprep.mubr.bf16.mxu0 %v2206_v16  ;;  %p3518_p12 = pnand %p3517_p11, %p3511_p8 }
 0x917   :  { %v2183_v46 = vadd.f32 %v4118_v36, %v2160_v41  ;;  %3092 = vmatmul.mubr.bf16.gmra.mrb[116].mxu0 %v2207_v9  ;;  %v2198_v60 = vmax.f32 %v2182_v22, 0.0  ;;  %v4283_v9 = vld [vmem:[#allocation44_spill] sm:$0xff]  ;;  %v4285_v41 = vld [vmem:[#allocation45_spill] sm:$0xff] }
 0x918   :  { %v2181_v6 = vadd.f32 %v4118_v36, %v2158_v33  ;;  %v2196_v34 = vmax.f32 %v2180_v38, 0.0  ;;  %v4286_v33 = vld [vmem:[#allocation43_spill] sm:$0xff] }
 0x919   :  { %v2199_v29 = vmax.f32 %v2183_v46, 0.0 }
 0x91a   :  { %v2197_v62 = vmax.f32 %v2181_v6, 0.0  ;;  %v3069_v25 = vpop.f32.mrb[108].mxu1 }
 0x91b   :  { %v2209_v53 = vpack.c.bf16 %v2199_v29, %v2198_v60  ;;  %v2163_v56 = vadd.f32 %v3069_v25, %v4275_v40  ;;  %v2134_v3 = vpop.f32.mrb[109].mxu1 }
 0x91c   :  { %v2161_v4 = vadd.f32 %v2134_v3, %v4276_v57  ;;  %v3070_v2 = vpop.f32.mrb[110].mxu1  ;;  %v2208_v54 = vpack.c.bf16 %v2197_v62, %v2196_v34 }
 0x91d   :  { %v2186_v5 = vadd.f32 %v4118_v36, %v2163_v56  ;;  %v2164_v59 = vadd.f32 %v3070_v2, %v4277_v15  ;;  %v2137_v13 = vpop.f32.mrb[111].mxu1  ;;  %v4287_v56 = vld [vmem:[#allocation50_spill] sm:$0xff] }
 0x91e   :  { %v2184_v17 = vadd.f32 %v4118_v36, %v2161_v4  ;;  %v2162_v21 = vadd.f32 %v2137_v13, %v4278_v44  ;;  %3095 = vmatprep.mubr.bf16.mxu1 %v2208_v54  ;;  %v4288_v54 = vld [vmem:[#allocation47_spill] sm:$0xff]  ;;  %v4289_v44 = vld [vmem:[#allocation52_spill] sm:$0xff] }
 0x91f   :  { %v2187_v8 = vadd.f32 %v4118_v36, %v2164_v59  ;;  %3096 = vmatmul.mubr.bf16.vlgmr.msra.gmra.mrb[112].mxu1 %v2209_v53  ;;  %v2202_v37 = vmax.f32 %v2186_v5, 0.0 }
 0x920   :  { %v2185_v12 = vadd.f32 %v4118_v36, %v2162_v21  ;;  %v2200_v20 = vmax.f32 %v2184_v17, 0.0 }
 0x921   :  { %v2203_v23 = vmax.f32 %v2187_v8, 0.0 }
 0x922   :  { %v2201_v14 = vmax.f32 %v2185_v12, 0.0 }
 0x923   :  { %v2211_v24 = vpack.c.bf16 %v2203_v23, %v2202_v37 }
 0x924   :  { %v2210_v49 = vpack.c.bf16 %v2201_v14, %v2200_v20  ;;  %v4290_v20 = vld [vmem:[#allocation49_spill] sm:$0xff] }
 0x926   :  { %3099 = vmatprep.mubr.bf16.mxu1 %v2210_v49 }
 0x927   :  { %3100 = vmatmul.mubr.bf16.gmra.mrb[116].mxu1 %v2211_v24 }
 0x9e2   :  { %v3089_v11 = vpop.f32.mrb[112].mxu0 }
 0x9e3   :  { %v2375_v52 = vadd.f32 %v3089_v11, %v4279_v27  ;;  %v2310_v55 = vpop.f32.mrb[113].mxu0 }
 0x9e4   :  { %v2373_v32 = vadd.f32 %v2310_v55, %v4280_v31  ;;  %v3090_v36 = vpop.f32.mrb[114].mxu0 }
 0x9e5   :  { %v2398_v50 = vadd.f32 %v4155_v39, %v2375_v52  ;;  %v2376_v63 = vadd.f32 %v3090_v36, %v4281_v7  ;;  %v2313_v48 = vpop.f32.mrb[115].mxu0 }
 0x9e6   :  { %v2396_v35 = vadd.f32 %v4155_v39, %v2373_v32  ;;  %v2374_v30 = vadd.f32 %v2313_v48, %v4282_v10  ;;  %v4292_v10 = vld [vmem:[#allocation54_spill] sm:$0xff] }
 0x9e7   :  { %v2657_v18 = vmul.f32 -1.442695, %v2398_v50  ;;  %v2399_v1 = vadd.f32 %v4155_v39, %v2376_v63  ;;  %v4291_v50 = vld [vmem:[#allocation58_spill] sm:$0xff] }
 0x9e8   :  { %v2655_v58 = vmul.f32 -1.442695, %v2396_v35  ;;  %v2397_v19 = vadd.f32 %v4155_v39, %v2374_v30 }
 0x9e9   :  { %3263 = vpow2.f32 %v2657_v18  ;;  %v2658_v26 = vmul.f32 -1.442695, %v2399_v1 }
 0x9ea   :  { %3265 = vpow2.f32 %v2655_v58  ;;  %v2656_v0 = vmul.f32 -1.442695, %v2397_v19  ;;  %v3093_v28 = vpop.f32.mrb[116].mxu0 }
 0x9eb   :  { %3267 = vpow2.f32 %v2658_v26  ;;  %v2379_v42 = vadd.f32 %v3093_v28, %v4283_v9  ;;  %v2326_v47 = vpop.f32.mrb[117].mxu0  ;;  %v4293_v26 = vld [vmem:[#allocation60_spill] sm:$0xff] }
 0x9ec   :  { %3269 = vpow2.f32 %v2656_v0  ;;  %v2377_v16 = vadd.f32 %v2326_v47, %v4284_v61  ;;  %v3094_v22 = vpop.f32.mrb[118].mxu0  ;;  %v4294_v61 = vld [vmem:[#allocation56_spill] sm:$0xff] }
 0x9ed   :  { %v2402_v45 = vadd.f32 %v4155_v39, %v2379_v42  ;;  %v2380_v43 = vadd.f32 %v3094_v22, %v4285_v41  ;;  %v2329_v38 = vpop.f32.mrb[119].mxu0 }
 0x9ee   :  { %v2400_v51 = vadd.f32 %v4155_v39, %v2377_v16  ;;  %v2378_v46 = vadd.f32 %v2329_v38, %v4286_v33 }
 0x9ef   :  { %v2661_v6 = vmul.f32 -1.442695, %v2402_v45  ;;  %v2403_v60 = vadd.f32 %v4155_v39, %v2380_v43 }
 0x9f0   :  { %v2659_v29 = vmul.f32 -1.442695, %v2400_v51  ;;  %v2401_v34 = vadd.f32 %v4155_v39, %v2378_v46 }
 0x9f1   :  { %3271 = vpow2.f32 %v2661_v6  ;;  %v2662_v62 = vmul.f32 -1.442695, %v2403_v60 }
 0x9f2   :  { %3273 = vpow2.f32 %v2659_v29  ;;  %v2660_v25 = vmul.f32 -1.442695, %v2401_v34  ;;  %v3097_v53 = vpop.f32.mrb[112].mxu1 }
 0x9f3   :  { %v3264_v40 = vpop.eup %3263  ;;  %3275 = vpow2.f32 %v2662_v62  ;;  %v2383_v3 = vadd.f32 %v3097_v53, %v4287_v56  ;;  %v2342_v57 = vpop.f32.mrb[113].mxu1 }
 0x9f4   :  { %v3266_v4 = vpop.eup %3265  ;;  %v2462_v2 = vadd.f32 1.0, %v3264_v40  ;;  %3277 = vpow2.f32 %v2660_v25  ;;  %v2381_v5 = vadd.f32 %v2342_v57, %v4288_v54  ;;  %v3098_v15 = vpop.f32.mrb[114].mxu1 }
 0x9f5   :  { %v3268_v59 = vpop.eup %3267  ;;  %v2460_v13 = vadd.f32 1.0, %v3266_v4  ;;  %v2406_v17 = vadd.f32 %v4155_v39, %v2383_v3  ;;  %v2384_v21 = vadd.f32 %v3098_v15, %v4289_v44  ;;  %v2345_v8 = vpop.f32.mrb[115].mxu1 }
 0x9f6   :  { %v3270_v12 = vpop.eup %3269  ;;  %3279 = vrcp.f32 %v2462_v2  ;;  %v2463_v37 = vadd.f32 1.0, %v3268_v59  ;;  %v2404_v23 = vadd.f32 %v4155_v39, %v2381_v5  ;;  %v2382_v14 = vadd.f32 %v2345_v8, %v4290_v20 }
 0x9f7   :  { %3281 = vrcp.f32 %v2460_v13  ;;  %v2461_v24 = vadd.f32 1.0, %v3270_v12  ;;  %v2665_v49 = vmul.f32 -1.442695, %v2406_v17  ;;  %v2407_v11 = vadd.f32 %v4155_v39, %v2384_v21 }
 0x9f8   :  { %3283 = vrcp.f32 %v2463_v37  ;;  %v2663_v27 = vmul.f32 -1.442695, %v2404_v23  ;;  %v2405_v52 = vadd.f32 %v4155_v39, %v2382_v14 }
 0x9f9   :  { %3285 = vrcp.f32 %v2461_v24  ;;  %v2666_v55 = vmul.f32 -1.442695, %v2407_v11 }
 0x9fa   :  { %3287 = vpow2.f32 %v2665_v49  ;;  %v2664_v31 = vmul.f32 -1.442695, %v2405_v52  ;;  %v3101_v32 = vpop.f32.mrb[116].mxu1 }
 0x9fb   :  { %v3272_v36 = vpop.eup %3271  ;;  %3289 = vpow2.f32 %v2663_v27  ;;  %v2387_v7 = vadd.f32 %v3101_v32, %v4291_v50  ;;  %v2358_v63 = vpop.f32.mrb[117].mxu1 }
 0x9fc   :  { %v3274_v48 = vpop.eup %3273  ;;  %v2466_v35 = vadd.f32 1.0, %v3272_v36  ;;  %3291 = vpow2.f32 %v2666_v55  ;;  %v2385_v30 = vadd.f32 %v2358_v63, %v4292_v10  ;;  %v3102_v18 = vpop.f32.mrb[118].mxu1 }
 0x9fd   :  { %v3276_v1 = vpop.eup %3275  ;;  %v2464_v58 = vadd.f32 1.0, %v3274_v48  ;;  %3293 = vpow2.f32 %v2664_v31  ;;  %v2410_v19 = vadd.f32 %v4155_v39, %v2387_v7  ;;  %v2388_v0 = vadd.f32 %v3102_v18, %v4293_v26  ;;  %v2361_v28 = vpop.f32.mrb[119].mxu1 }
 0x9fe   :  { %v3278_v9 = vpop.eup %3277  ;;  %3295 = vrcp.f32 %v2466_v35  ;;  %v2467_v42 = vadd.f32 1.0, %v3276_v1  ;;  %v2408_v47 = vadd.f32 %v4155_v39, %v2385_v30  ;;  %v2386_v16 = vadd.f32 %v2361_v28, %v4294_v61 }
 0x9ff   :  { %3297 = vrcp.f32 %v2464_v58  ;;  %v2465_v22 = vadd.f32 1.0, %v3278_v9  ;;  %v2669_v45 = vmul.f32 -1.442695, %v2410_v19  ;;  %v2411_v41 = vadd.f32 %v4155_v39, %v2388_v0 }
 0xa00   :  { %v3280_v43 = vpop.eup %3279  ;;  %3299 = vrcp.f32 %v2467_v42  ;;  %v2667_v38 = vmul.f32 -1.442695, %v2408_v47  ;;  %v2409_v51 = vadd.f32 %v4155_v39, %v2386_v16 }
 0xa01   :  { %v3282_v33 = vpop.eup %3281  ;;  %2510 = vst [vmem:[#allocation16 + $0x10] sm:$0xff] %v3280_v43  ;;  %3301 = vrcp.f32 %v2465_v22  ;;  %v2670_v46 = vmul.f32 -1.442695, %v2411_v41 }
 0xa02   :  { %v3284_v6 = vpop.eup %3283  ;;  %2508 = vst [vmem:[#allocation16] sm:$0xff] %v3282_v33  ;;  %3303 = vpow2.f32 %v2669_v45  ;;  %v2668_v60 = vmul.f32 -1.442695, %v2409_v51 }
 0xa03   :  { %v3286_v29 = vpop.eup %3285  ;;  %2511 = vst [vmem:[#allocation16 + $0x18] sm:$0xff] %v3284_v6  ;;  %3305 = vpow2.f32 %v2667_v38 }
 0xa04   :  { %v3288_v34 = vpop.eup %3287  ;;  %2509 = vst [vmem:[#allocation16 + $0x8] sm:$0xff] %v3286_v29  ;;  %3307 = vpow2.f32 %v2670_v46 }
 0xa05   :  { %v3290_v62 = vpop.eup %3289  ;;  %v2470_v25 = vadd.f32 1.0, %v3288_v34  ;;  %3309 = vpow2.f32 %v2668_v60 }
 0xa06   :  { %v3292_v53 = vpop.eup %3291  ;;  %v2468_v40 = vadd.f32 1.0, %v3290_v62 }
 0xa07   :  { %v3294_v39 = vpop.eup %3293  ;;  %3311 = vrcp.f32 %v2470_v25  ;;  %v2471_v56 = vadd.f32 1.0, %v3292_v53 }
 0xa08   :  { %v3296_v3 = vpop.eup %3295  ;;  %3313 = vrcp.f32 %v2468_v40  ;;  %v2469_v57 = vadd.f32 1.0, %v3294_v39 }
 0xa09   :  { %v3298_v4 = vpop.eup %3297  ;;  %2514 = vst [vmem:[#allocation16 + $0x30] sm:$0xff] %v3296_v3  ;;  %3315 = vrcp.f32 %v2471_v56 }
 0xa0a   :  { %v3300_v2 = vpop.eup %3299  ;;  %2512 = vst [vmem:[#allocation16 + $0x20] sm:$0xff] %v3298_v4  ;;  %3317 = vrcp.f32 %v2469_v57 }
 0xa0b   :  { %v3302_v54 = vpop.eup %3301  ;;  %2515 = vst [vmem:[#allocation16 + $0x38] sm:$0xff] %v3300_v2 }
 0xa0c   :  { %v3304_v5 = vpop.eup %3303  ;;  %2513 = vst [vmem:[#allocation16 + $0x28] sm:$0xff] %v3302_v54 }
 0xa0d   :  { %v3306_v15 = vpop.eup %3305  ;;  %v2474_v59 = vadd.f32 1.0, %v3304_v5 }
 0xa0e   :  { %v3308_v13 = vpop.eup %3307  ;;  %v2472_v17 = vadd.f32 1.0, %v3306_v15 }
 0xa0f   :  { %v3310_v44 = vpop.eup %3309  ;;  %3319 = vrcp.f32 %v2474_v59  ;;  %v2475_v21 = vadd.f32 1.0, %v3308_v13 }
 0xa10   :  { %3321 = vrcp.f32 %v2472_v17  ;;  %v2473_v8 = vadd.f32 1.0, %v3310_v44 }
 0xa11   :  { %v3312_v12 = vpop.eup %3311  ;;  %3323 = vrcp.f32 %v2475_v21 }
 0xa12   :  { %v3314_v37 = vpop.eup %3313  ;;  %2518 = vst [vmem:[#allocation16 + $0x50] sm:$0xff] %v3312_v12  ;;  %3325 = vrcp.f32 %v2473_v8 }
 0xa13   :  { %v3316_v23 = vpop.eup %3315  ;;  %2516 = vst [vmem:[#allocation16 + $0x40] sm:$0xff] %v3314_v37 }
 0xa14   :  { %v3318_v20 = vpop.eup %3317  ;;  %2519 = vst [vmem:[#allocation16 + $0x58] sm:$0xff] %v3316_v23 }
 0xa15   :  { %2517 = vst [vmem:[#allocation16 + $0x48] sm:$0xff] %v3318_v20 }
 0xa19   :  { %v3320_v14 = vpop.eup %3319 }
 0xa1a   :  { %v3322_v24 = vpop.eup %3321  ;;  %2522 = vst [vmem:[#allocation16 + $0x70] sm:$0xff] %v3320_v14 }
 0xa1b   :  { %v3324_v49 = vpop.eup %3323  ;;  %2520 = vst [vmem:[#allocation16 + $0x60] sm:$0xff] %v3322_v24 }
 0xa1c   :  { %v3326_v11 = vpop.eup %3325  ;;  %2523 = vst [vmem:[#allocation16 + $0x78] sm:$0xff] %v3324_v49 }
 0xa1d   :  { %2521 = vst [vmem:[#allocation16 + $0x68] sm:$0xff] %v3326_v11 }
 0xa1e   :  { %3521 = shalt.err (!%p3518_p12)
}
 0xa1f   :  { %s3522_s18 = scalar_lea.hbm %s4215_s14, 2048 }
 0xa20   :  { %p3523_p13 = scmp.ne.s32.totalorder %s4215_s14, %s3522_s18  ;;  %p3526_p0 = scmp.lt.u32.totalorder %s3522_s18, %s4215_s14 }
 0xa22   :  { %p3528_p1 = pnand %p3526_p0, %p3523_p13 }
 0xa24   :  { %3531 = shalt.err (!%p3528_p1)
}
 0xa25   :  { %s3558_s1 = smov 128   ;;  %s3559_s30 = smov 8  }
 0xa26   :  { %2535 = dma.vmem_to_hbm [thread:$0]  %s2530_s17, 2048, %s4215_s14, [#allocation4], %s3558_s1, %s3558_s1, %s3559_s30  }
 0xa27   :  { %3542 = dma.done.wait [#allocation4], 2048  }
 0xa28   :  { %3543 = vsyncadd [#allocation4], 4294965248 }
 0xa29   :  { %2539 = vsyncpa [#allocation3], 1 }
 0xa2a   :  { %2540 = vsyncpa [#allocation6], 1 }
 0xa2b   :  { %2541 = vsyncpa [#allocation9], 1 }
 0xa2c   :  { %2542 = vsyncpa [#allocation12], 1 }
 0xa2d   :  { %2543 = vsyncpa [#allocation15], 1 }
 0xa2e   :  { %2544 = vsyncpa [#allocation4], 1 }

</bundles_post_ra>
